<compile_context>
chip_gen: v6e
topology: v6e:2x2x1
jax: 0.10.0
libtpu: 0.0.40
codegen_flags: <defaults>
</compile_context>

<pallas_src>
import functools

import jax
import jax.numpy as jnp
import numpy as np
from jax import lax
from jax.experimental import pallas as pl
from jax.experimental.pallas import tpu as pltpu


def _decoder_rnn_kernel(feat_ref, pose_ref, wih_ref, whh_ref, bias_ref,
                        weff_ref, beff_ref, y_ref, *, H, Hp):
    """Fused DecoderRNN forward.

    feat_ref : (B, D_in)       image features (timestep 0 input)
    pose_ref : (B, T, D_in)    pose_coordinates (timesteps 1..T-1 use rows :-1)
    wih_ref  : (D_in, 4*Hp)    gate-lane-padded W_ih^T, gate order (i, f, o, g)
    whh_ref  : (H, 4*Hp)       gate-lane-padded W_hh^T
    bias_ref : (1, 4*Hp)       b_ih + b_hh, gate-lane-padded
    weff_ref : (Hp, D_in)      W1^T @ W2^T (fc2∘fc1 composed), zero pad rows
    beff_ref : (1, D_in)       b1 @ W2^T + b2
    y_ref    : (B, T, D_in)    output
    """
    B, D_in = feat_ref.shape
    T = pose_ref.shape[1]
    G = 4 * Hp
    f32 = jnp.float32

    # Loop-invariant weights: load once (hoisted out of the time loop).
    wih = wih_ref[...]                        # (D_in, G)
    whh = whh_ref[...]                        # (H, G)
    bias = bias_ref[...]                      # (1, G)

    # ---- hoisted input projection: one batched MXU matmul over all rows ----
    # t = 0 uses `features`; t >= 1 uses pose[:, t-1].  We project the full
    # pose tensor (its last timestep is simply never read) so the reshape sits
    # on a clean 8-sublane tile boundary and no in-kernel concat is needed.
    gx0 = jnp.dot(feat_ref[...], wih, preferred_element_type=f32) + bias  # (B, G)
    xp = pose_ref[...].reshape(B * T, D_in)
    gxp = (jnp.dot(xp, wih, preferred_element_type=f32) + bias).reshape(B, T, G)

    # ---- serial LSTM recurrence (the only inherently sequential part) ----
    h = jnp.zeros((B, H), f32)                # real lanes only (dot contraction)
    c = jnp.zeros((B, Hp), f32)               # padded lanes stay exactly 0
    hs = []
    for t in range(T):                        # static T: fully unrolled
        gx_t = gx0 if t == 0 else gxp[:, t - 1, :]
        gates = gx_t + jnp.dot(h, whh, preferred_element_type=f32)    # (B, G)
        # Gate layout (lane groups of width Hp): [i, f, o, g].
        s = jax.nn.sigmoid(gates[:, :3 * Hp])        # one EUP slab: i, f, o
        i_g = s[:, 0 * Hp:1 * Hp]
        f_g = s[:, 1 * Hp:2 * Hp]
        o_g = s[:, 2 * Hp:3 * Hp]
        g_g = jnp.tanh(gates[:, 3 * Hp:4 * Hp])
        c = f_g * c + i_g * g_g                      # lane-aligned, no rotates
        h_full = o_g * jnp.tanh(c)                   # (B, Hp), pad lanes == 0
        hs.append(h_full)
        h = h_full[:, :H]                            # offset-0 lane slice

    # ---- fused output projection: fc2(fc1(h)) == h @ W_eff + b_eff ----
    # Assembled per batch row so the kernel emits (B, T, D_in) directly
    # (no B<->T transpose anywhere, in kernel or wrapper).
    weff = weff_ref[...]                      # (Hp, D_in)
    beff = beff_ref[...]                      # (1, D_in)
    for b in range(B):
        h_b = jnp.concatenate([hv[b:b + 1, :] for hv in hs], axis=0)  # (T, Hp)
        y_ref[b] = jnp.dot(h_b, weff, preferred_element_type=f32) + beff


def decoder_rnn_forward(features, pose_coordinates, params):
    """features: (B, D_in), pose_coordinates: (B, T, D_in) -> (B, T, D_in)."""
    w_ih, w_hh, b_ih, b_hh, w1, b1, w2, b2 = params
    f32 = jnp.float32
    B, D_in = features.shape
    T = pose_coordinates.shape[1]
    H = w_hh.shape[1]                         # w_hh: (4H, H)
    Hp = -(-H // 128) * 128                   # gate lane stride (mult. of 128)
    G = 4 * Hp

    # PyTorch LSTM stacks gate rows as (i, f, g, o); repack as (i, f, o, g) so
    # sigmoid covers one contiguous 3*Hp lane span inside the kernel.
    order = (0, 1, 3, 2)

    def pack_gate_cols(w):                    # (4H, X) -> (X, G), zero pad lanes
        blocks = []
        for g in order:
            blk = w[g * H:(g + 1) * H, :].astype(f32).T          # (X, H)
            blocks.append(jnp.pad(blk, ((0, 0), (0, Hp - H))))
        return jnp.concatenate(blocks, axis=1)

    wih_p = pack_gate_cols(w_ih)              # (D_in, G)
    whh_p = pack_gate_cols(w_hh)              # (H, G)

    b_g = (b_ih + b_hh).astype(f32)
    bias_p = jnp.concatenate(
        [jnp.pad(b_g[g * H:(g + 1) * H], (0, Hp - H)) for g in order]
    ).reshape(1, G)

    # fc2(fc1(x)) has no nonlinearity in between -> compose once at HIGHEST
    # precision (off the hot path): W_eff = W1^T @ W2^T, b_eff = b1 @ W2^T + b2.
    w_eff = jnp.dot(w1.T.astype(f32), w2.T.astype(f32),
                    precision=lax.Precision.HIGHEST)             # (H, D_in)
    w_eff_p = jnp.pad(w_eff, ((0, Hp - H), (0, 0)))              # (Hp, D_in)
    b_eff = (jnp.dot(b1.astype(f32), w2.T.astype(f32),
                     precision=lax.Precision.HIGHEST)
             + b2.astype(f32)).reshape(1, D_in)

    vmem = pl.BlockSpec(memory_space=pltpu.MemorySpace.VMEM)
    kernel = functools.partial(_decoder_rnn_kernel, H=H, Hp=Hp)
    return pl.pallas_call(
        kernel,
        out_shape=jax.ShapeDtypeStruct((B, T, D_in), f32),
        in_specs=[vmem] * 7,
        out_specs=vmem,
    )(features.astype(f32), pose_coordinates.astype(f32),
      wih_p, whh_p, bias_p, w_eff_p, b_eff)


def _reference_forward(features, pose_coordinates, params):
    """Pure-JAX reference (lax.scan LSTM + fc1 + fc2), default matmul precision."""
    w_ih, w_hh, b_ih, b_hh, w1, b1, w2, b2 = params
    H = w_hh.shape[1]
    inputs = jnp.concatenate([features[:, None, :], pose_coordinates[:, :-1]], axis=1)
    B = inputs.shape[0]

    def step(carry, x_t):
        h, c = carry
        gates = x_t @ w_ih.T + h @ w_hh.T + b_ih + b_hh
        i = jax.nn.sigmoid(gates[:, 0 * H:1 * H])
        f = jax.nn.sigmoid(gates[:, 1 * H:2 * H])
        g = jnp.tanh(gates[:, 2 * H:3 * H])
        o = jax.nn.sigmoid(gates[:, 3 * H:4 * H])
        c = f * c + i * g
        h = o * jnp.tanh(c)
        return (h, c), h

    h0 = jnp.zeros((B, H), jnp.float32)
    (_, _), hs = lax.scan(step, (h0, h0), jnp.transpose(inputs, (1, 0, 2)))
    out = jnp.transpose(hs, (1, 0, 2))        # (B, T, H)
    x = out @ w1.T + b1
    x = x @ w2.T + b2
    return x


def init_params(key, input_size, hidden_size):
    """Deterministic init matching nn.LSTM / nn.Linear parameter shapes."""
    ks = jax.random.split(key, 8)
    bound = 1.0 / np.sqrt(hidden_size)
    u = lambda k, shape, b: jax.random.uniform(k, shape, jnp.float32, -b, b)
    w_ih = u(ks[0], (4 * hidden_size, input_size), bound)
    w_hh = u(ks[1], (4 * hidden_size, hidden_size), bound)
    b_ih = u(ks[2], (4 * hidden_size,), bound)
    b_hh = u(ks[3], (4 * hidden_size,), bound)
    b1_bound = 1.0 / np.sqrt(hidden_size)
    w1 = u(ks[4], (2 * hidden_size, hidden_size), b1_bound)
    b1 = u(ks[5], (2 * hidden_size,), b1_bound)
    b2_bound = 1.0 / np.sqrt(2 * hidden_size)
    w2 = u(ks[6], (input_size, 2 * hidden_size), b2_bound)
    b2 = u(ks[7], (input_size,), b2_bound)
    return (w_ih, w_hh, b_ih, b_hh, w1, b1, w2, b2)


if __name__ == "__main__":
    B, T_pose, D_in, H = 2, 8, 16, 32

    key = jax.random.PRNGKey(0)
    k_par, k_feat, k_pose = jax.random.split(key, 3)
    params = init_params(k_par, D_in, H)
    features = jax.random.normal(k_feat, (B, D_in), jnp.float32)
    poses = jax.random.normal(k_pose, (B, T_pose, D_in), jnp.float32)

    fwd = jax.jit(decoder_rnn_forward)
    out = jax.block_until_ready(fwd(features, poses, params))

    ref = jax.block_until_ready(_reference_forward(features, poses, params))
    assert out.shape == (B, T_pose, D_in), out.shape
    # Tolerance accounts for default (bf16-pass) MXU precision plus the exact
    # algebraic fc1*fc2 composition, which rounds differently from two matmuls.
    np.testing.assert_allclose(np.asarray(out), np.asarray(ref), atol=3e-2, rtol=3e-2)

    print("KERNEL_OK")
</pallas_src>

<mosaic_0001>
module attributes {stable_mosaic.version = 11 : i64} {
  func.func @_decoder_rnn_kernel(%arg0: memref<2x16xf32, #tpu.memory_space<vmem>>, %arg1: memref<2x8x16xf32, #tpu.memory_space<vmem>>, %arg2: memref<16x512xf32, #tpu.memory_space<vmem>>, %arg3: memref<32x512xf32, #tpu.memory_space<vmem>>, %arg4: memref<1x512xf32, #tpu.memory_space<vmem>>, %arg5: memref<128x16xf32, #tpu.memory_space<vmem>>, %arg6: memref<1x16xf32, #tpu.memory_space<vmem>>, %arg7: memref<2x8x16xf32, #tpu.memory_space<vmem>>) attributes {dimension_semantics = [], scalar_prefetch = 0 : i64, scratch_operands = 0 : i64, tpu.core_type = #tpu.core_type<tc>} {
    %c0 = arith.constant 0 : index
    %c0_0 = arith.constant 0 : index
    %0 = vector.load %arg2[%c0, %c0_0] : memref<16x512xf32, #tpu.memory_space<vmem>>, vector<16x512xf32>
    %c0_1 = arith.constant 0 : index
    %c0_2 = arith.constant 0 : index
    %1 = vector.load %arg3[%c0_1, %c0_2] : memref<32x512xf32, #tpu.memory_space<vmem>>, vector<32x512xf32>
    %c0_3 = arith.constant 0 : index
    %c0_4 = arith.constant 0 : index
    %2 = vector.load %arg4[%c0_3, %c0_4] : memref<1x512xf32, #tpu.memory_space<vmem>>, vector<1x512xf32>
    %c0_5 = arith.constant 0 : index
    %c0_6 = arith.constant 0 : index
    %3 = vector.load %arg0[%c0_5, %c0_6] : memref<2x16xf32, #tpu.memory_space<vmem>>, vector<2x16xf32>
    %cst = arith.constant dense<0.000000e+00> : vector<2x512xf32>
    %4 = tpu.matmul %3, %0, %cst {dimension_numbers = #tpu.dot_dimension_numbers<[1], [0], [0], [1], [0, 0, 1, 1], [], []>} : vector<2x16xf32>, vector<16x512xf32>, vector<2x512xf32> -> vector<2x512xf32>
    %5 = vector.broadcast %2 : vector<1x512xf32> to vector<2x512xf32>
    %6 = arith.addf %4, %5 : vector<2x512xf32>
    %c0_7 = arith.constant 0 : index
    %c0_8 = arith.constant 0 : index
    %c0_9 = arith.constant 0 : index
    %7 = vector.load %arg1[%c0_7, %c0_8, %c0_9] : memref<2x8x16xf32, #tpu.memory_space<vmem>>, vector<2x8x16xf32>
    %8 = vector.shape_cast %7 : vector<2x8x16xf32> to vector<16x16xf32>
    %cst_10 = arith.constant dense<0.000000e+00> : vector<16x512xf32>
    %9 = tpu.matmul %8, %0, %cst_10 {dimension_numbers = #tpu.dot_dimension_numbers<[1], [0], [0], [1], [0, 0, 1, 1], [], []>} : vector<16x16xf32>, vector<16x512xf32>, vector<16x512xf32> -> vector<16x512xf32>
    %10 = vector.broadcast %2 : vector<1x512xf32> to vector<16x512xf32>
    %11 = arith.addf %9, %10 : vector<16x512xf32>
    %12 = vector.shape_cast %11 : vector<16x512xf32> to vector<2x8x512xf32>
    %cst_11 = arith.constant 0.000000e+00 : f32
    %13 = vector.broadcast %cst_11 : f32 to vector<2x32xf32>
    %cst_12 = arith.constant 0.000000e+00 : f32
    %14 = vector.broadcast %cst_12 : f32 to vector<2x128xf32>
    %cst_13 = arith.constant dense<0.000000e+00> : vector<2x512xf32>
    %15 = tpu.matmul %13, %1, %cst_13 {dimension_numbers = #tpu.dot_dimension_numbers<[1], [0], [0], [1], [0, 0, 1, 1], [], []>} : vector<2x32xf32>, vector<32x512xf32>, vector<2x512xf32> -> vector<2x512xf32>
    %16 = arith.addf %6, %15 : vector<2x512xf32>
    %17 = vector.extract_strided_slice %16 {offsets = [0, 0], sizes = [2, 384], strides = [1, 1]} : vector<2x512xf32> to vector<2x384xf32>
    %18 = arith.negf %17 : vector<2x384xf32>
    %19 = math.exp %18 : vector<2x384xf32>
    %cst_14 = arith.constant 1.000000e+00 : f32
    %20 = vector.broadcast %cst_14 : f32 to vector<2x384xf32>
    %21 = arith.addf %20, %19 : vector<2x384xf32>
    %22 = arith.divf %20, %21 : vector<2x384xf32>
    %23 = vector.extract_strided_slice %22 {offsets = [0, 0], sizes = [2, 128], strides = [1, 1]} : vector<2x384xf32> to vector<2x128xf32>
    %24 = vector.extract_strided_slice %22 {offsets = [0, 128], sizes = [2, 128], strides = [1, 1]} : vector<2x384xf32> to vector<2x128xf32>
    %25 = vector.extract_strided_slice %22 {offsets = [0, 256], sizes = [2, 128], strides = [1, 1]} : vector<2x384xf32> to vector<2x128xf32>
    %26 = vector.extract_strided_slice %16 {offsets = [0, 384], sizes = [2, 128], strides = [1, 1]} : vector<2x512xf32> to vector<2x128xf32>
    %27 = math.tanh %26 : vector<2x128xf32>
    %28 = arith.mulf %24, %14 : vector<2x128xf32>
    %29 = arith.mulf %23, %27 : vector<2x128xf32>
    %30 = arith.addf %28, %29 : vector<2x128xf32>
    %31 = math.tanh %30 : vector<2x128xf32>
    %32 = arith.mulf %25, %31 : vector<2x128xf32>
    %33 = vector.extract_strided_slice %32 {offsets = [0, 0], sizes = [2, 32], strides = [1, 1]} : vector<2x128xf32> to vector<2x32xf32>
    %34 = vector.extract_strided_slice %12 {offsets = [0, 0, 0], sizes = [2, 1, 512], strides = [1, 1, 1]} : vector<2x8x512xf32> to vector<2x1x512xf32>
    %35 = vector.shape_cast %34 : vector<2x1x512xf32> to vector<2x512xf32>
    %cst_15 = arith.constant dense<0.000000e+00> : vector<2x512xf32>
    %36 = tpu.matmul %33, %1, %cst_15 {dimension_numbers = #tpu.dot_dimension_numbers<[1], [0], [0], [1], [0, 0, 1, 1], [], []>} : vector<2x32xf32>, vector<32x512xf32>, vector<2x512xf32> -> vector<2x512xf32>
    %37 = arith.addf %35, %36 : vector<2x512xf32>
    %38 = vector.extract_strided_slice %37 {offsets = [0, 0], sizes = [2, 384], strides = [1, 1]} : vector<2x512xf32> to vector<2x384xf32>
    %39 = arith.negf %38 : vector<2x384xf32>
    %40 = math.exp %39 : vector<2x384xf32>
    %cst_16 = arith.constant 1.000000e+00 : f32
    %41 = vector.broadcast %cst_16 : f32 to vector<2x384xf32>
    %42 = arith.addf %41, %40 : vector<2x384xf32>
    %43 = arith.divf %41, %42 : vector<2x384xf32>
    %44 = vector.extract_strided_slice %43 {offsets = [0, 0], sizes = [2, 128], strides = [1, 1]} : vector<2x384xf32> to vector<2x128xf32>
    %45 = vector.extract_strided_slice %43 {offsets = [0, 128], sizes = [2, 128], strides = [1, 1]} : vector<2x384xf32> to vector<2x128xf32>
    %46 = vector.extract_strided_slice %43 {offsets = [0, 256], sizes = [2, 128], strides = [1, 1]} : vector<2x384xf32> to vector<2x128xf32>
    %47 = vector.extract_strided_slice %37 {offsets = [0, 384], sizes = [2, 128], strides = [1, 1]} : vector<2x512xf32> to vector<2x128xf32>
    %48 = math.tanh %47 : vector<2x128xf32>
    %49 = arith.mulf %45, %30 : vector<2x128xf32>
    %50 = arith.mulf %44, %48 : vector<2x128xf32>
    %51 = arith.addf %49, %50 : vector<2x128xf32>
    %52 = math.tanh %51 : vector<2x128xf32>
    %53 = arith.mulf %46, %52 : vector<2x128xf32>
    %54 = vector.extract_strided_slice %53 {offsets = [0, 0], sizes = [2, 32], strides = [1, 1]} : vector<2x128xf32> to vector<2x32xf32>
    %55 = vector.extract_strided_slice %12 {offsets = [0, 1, 0], sizes = [2, 1, 512], strides = [1, 1, 1]} : vector<2x8x512xf32> to vector<2x1x512xf32>
    %56 = vector.shape_cast %55 : vector<2x1x512xf32> to vector<2x512xf32>
    %cst_17 = arith.constant dense<0.000000e+00> : vector<2x512xf32>
    %57 = tpu.matmul %54, %1, %cst_17 {dimension_numbers = #tpu.dot_dimension_numbers<[1], [0], [0], [1], [0, 0, 1, 1], [], []>} : vector<2x32xf32>, vector<32x512xf32>, vector<2x512xf32> -> vector<2x512xf32>
    %58 = arith.addf %56, %57 : vector<2x512xf32>
    %59 = vector.extract_strided_slice %58 {offsets = [0, 0], sizes = [2, 384], strides = [1, 1]} : vector<2x512xf32> to vector<2x384xf32>
    %60 = arith.negf %59 : vector<2x384xf32>
    %61 = math.exp %60 : vector<2x384xf32>
    %cst_18 = arith.constant 1.000000e+00 : f32
    %62 = vector.broadcast %cst_18 : f32 to vector<2x384xf32>
    %63 = arith.addf %62, %61 : vector<2x384xf32>
    %64 = arith.divf %62, %63 : vector<2x384xf32>
    %65 = vector.extract_strided_slice %64 {offsets = [0, 0], sizes = [2, 128], strides = [1, 1]} : vector<2x384xf32> to vector<2x128xf32>
    %66 = vector.extract_strided_slice %64 {offsets = [0, 128], sizes = [2, 128], strides = [1, 1]} : vector<2x384xf32> to vector<2x128xf32>
    %67 = vector.extract_strided_slice %64 {offsets = [0, 256], sizes = [2, 128], strides = [1, 1]} : vector<2x384xf32> to vector<2x128xf32>
    %68 = vector.extract_strided_slice %58 {offsets = [0, 384], sizes = [2, 128], strides = [1, 1]} : vector<2x512xf32> to vector<2x128xf32>
    %69 = math.tanh %68 : vector<2x128xf32>
    %70 = arith.mulf %66, %51 : vector<2x128xf32>
    %71 = arith.mulf %65, %69 : vector<2x128xf32>
    %72 = arith.addf %70, %71 : vector<2x128xf32>
    %73 = math.tanh %72 : vector<2x128xf32>
    %74 = arith.mulf %67, %73 : vector<2x128xf32>
    %75 = vector.extract_strided_slice %74 {offsets = [0, 0], sizes = [2, 32], strides = [1, 1]} : vector<2x128xf32> to vector<2x32xf32>
    %76 = vector.extract_strided_slice %12 {offsets = [0, 2, 0], sizes = [2, 1, 512], strides = [1, 1, 1]} : vector<2x8x512xf32> to vector<2x1x512xf32>
    %77 = vector.shape_cast %76 : vector<2x1x512xf32> to vector<2x512xf32>
    %cst_19 = arith.constant dense<0.000000e+00> : vector<2x512xf32>
    %78 = tpu.matmul %75, %1, %cst_19 {dimension_numbers = #tpu.dot_dimension_numbers<[1], [0], [0], [1], [0, 0, 1, 1], [], []>} : vector<2x32xf32>, vector<32x512xf32>, vector<2x512xf32> -> vector<2x512xf32>
    %79 = arith.addf %77, %78 : vector<2x512xf32>
    %80 = vector.extract_strided_slice %79 {offsets = [0, 0], sizes = [2, 384], strides = [1, 1]} : vector<2x512xf32> to vector<2x384xf32>
    %81 = arith.negf %80 : vector<2x384xf32>
    %82 = math.exp %81 : vector<2x384xf32>
    %cst_20 = arith.constant 1.000000e+00 : f32
    %83 = vector.broadcast %cst_20 : f32 to vector<2x384xf32>
    %84 = arith.addf %83, %82 : vector<2x384xf32>
    %85 = arith.divf %83, %84 : vector<2x384xf32>
    %86 = vector.extract_strided_slice %85 {offsets = [0, 0], sizes = [2, 128], strides = [1, 1]} : vector<2x384xf32> to vector<2x128xf32>
    %87 = vector.extract_strided_slice %85 {offsets = [0, 128], sizes = [2, 128], strides = [1, 1]} : vector<2x384xf32> to vector<2x128xf32>
    %88 = vector.extract_strided_slice %85 {offsets = [0, 256], sizes = [2, 128], strides = [1, 1]} : vector<2x384xf32> to vector<2x128xf32>
    %89 = vector.extract_strided_slice %79 {offsets = [0, 384], sizes = [2, 128], strides = [1, 1]} : vector<2x512xf32> to vector<2x128xf32>
    %90 = math.tanh %89 : vector<2x128xf32>
    %91 = arith.mulf %87, %72 : vector<2x128xf32>
    %92 = arith.mulf %86, %90 : vector<2x128xf32>
    %93 = arith.addf %91, %92 : vector<2x128xf32>
    %94 = math.tanh %93 : vector<2x128xf32>
    %95 = arith.mulf %88, %94 : vector<2x128xf32>
    %96 = vector.extract_strided_slice %95 {offsets = [0, 0], sizes = [2, 32], strides = [1, 1]} : vector<2x128xf32> to vector<2x32xf32>
    %97 = vector.extract_strided_slice %12 {offsets = [0, 3, 0], sizes = [2, 1, 512], strides = [1, 1, 1]} : vector<2x8x512xf32> to vector<2x1x512xf32>
    %98 = vector.shape_cast %97 : vector<2x1x512xf32> to vector<2x512xf32>
    %cst_21 = arith.constant dense<0.000000e+00> : vector<2x512xf32>
    %99 = tpu.matmul %96, %1, %cst_21 {dimension_numbers = #tpu.dot_dimension_numbers<[1], [0], [0], [1], [0, 0, 1, 1], [], []>} : vector<2x32xf32>, vector<32x512xf32>, vector<2x512xf32> -> vector<2x512xf32>
    %100 = arith.addf %98, %99 : vector<2x512xf32>
    %101 = vector.extract_strided_slice %100 {offsets = [0, 0], sizes = [2, 384], strides = [1, 1]} : vector<2x512xf32> to vector<2x384xf32>
    %102 = arith.negf %101 : vector<2x384xf32>
    %103 = math.exp %102 : vector<2x384xf32>
    %cst_22 = arith.constant 1.000000e+00 : f32
    %104 = vector.broadcast %cst_22 : f32 to vector<2x384xf32>
    %105 = arith.addf %104, %103 : vector<2x384xf32>
    %106 = arith.divf %104, %105 : vector<2x384xf32>
    %107 = vector.extract_strided_slice %106 {offsets = [0, 0], sizes = [2, 128], strides = [1, 1]} : vector<2x384xf32> to vector<2x128xf32>
    %108 = vector.extract_strided_slice %106 {offsets = [0, 128], sizes = [2, 128], strides = [1, 1]} : vector<2x384xf32> to vector<2x128xf32>
    %109 = vector.extract_strided_slice %106 {offsets = [0, 256], sizes = [2, 128], strides = [1, 1]} : vector<2x384xf32> to vector<2x128xf32>
    %110 = vector.extract_strided_slice %100 {offsets = [0, 384], sizes = [2, 128], strides = [1, 1]} : vector<2x512xf32> to vector<2x128xf32>
    %111 = math.tanh %110 : vector<2x128xf32>
    %112 = arith.mulf %108, %93 : vector<2x128xf32>
    %113 = arith.mulf %107, %111 : vector<2x128xf32>
    %114 = arith.addf %112, %113 : vector<2x128xf32>
    %115 = math.tanh %114 : vector<2x128xf32>
    %116 = arith.mulf %109, %115 : vector<2x128xf32>
    %117 = vector.extract_strided_slice %116 {offsets = [0, 0], sizes = [2, 32], strides = [1, 1]} : vector<2x128xf32> to vector<2x32xf32>
    %118 = vector.extract_strided_slice %12 {offsets = [0, 4, 0], sizes = [2, 1, 512], strides = [1, 1, 1]} : vector<2x8x512xf32> to vector<2x1x512xf32>
    %119 = vector.shape_cast %118 : vector<2x1x512xf32> to vector<2x512xf32>
    %cst_23 = arith.constant dense<0.000000e+00> : vector<2x512xf32>
    %120 = tpu.matmul %117, %1, %cst_23 {dimension_numbers = #tpu.dot_dimension_numbers<[1], [0], [0], [1], [0, 0, 1, 1], [], []>} : vector<2x32xf32>, vector<32x512xf32>, vector<2x512xf32> -> vector<2x512xf32>
    %121 = arith.addf %119, %120 : vector<2x512xf32>
    %122 = vector.extract_strided_slice %121 {offsets = [0, 0], sizes = [2, 384], strides = [1, 1]} : vector<2x512xf32> to vector<2x384xf32>
    %123 = arith.negf %122 : vector<2x384xf32>
    %124 = math.exp %123 : vector<2x384xf32>
    %cst_24 = arith.constant 1.000000e+00 : f32
    %125 = vector.broadcast %cst_24 : f32 to vector<2x384xf32>
    %126 = arith.addf %125, %124 : vector<2x384xf32>
    %127 = arith.divf %125, %126 : vector<2x384xf32>
    %128 = vector.extract_strided_slice %127 {offsets = [0, 0], sizes = [2, 128], strides = [1, 1]} : vector<2x384xf32> to vector<2x128xf32>
    %129 = vector.extract_strided_slice %127 {offsets = [0, 128], sizes = [2, 128], strides = [1, 1]} : vector<2x384xf32> to vector<2x128xf32>
    %130 = vector.extract_strided_slice %127 {offsets = [0, 256], sizes = [2, 128], strides = [1, 1]} : vector<2x384xf32> to vector<2x128xf32>
    %131 = vector.extract_strided_slice %121 {offsets = [0, 384], sizes = [2, 128], strides = [1, 1]} : vector<2x512xf32> to vector<2x128xf32>
    %132 = math.tanh %131 : vector<2x128xf32>
    %133 = arith.mulf %129, %114 : vector<2x128xf32>
    %134 = arith.mulf %128, %132 : vector<2x128xf32>
    %135 = arith.addf %133, %134 : vector<2x128xf32>
    %136 = math.tanh %135 : vector<2x128xf32>
    %137 = arith.mulf %130, %136 : vector<2x128xf32>
    %138 = vector.extract_strided_slice %137 {offsets = [0, 0], sizes = [2, 32], strides = [1, 1]} : vector<2x128xf32> to vector<2x32xf32>
    %139 = vector.extract_strided_slice %12 {offsets = [0, 5, 0], sizes = [2, 1, 512], strides = [1, 1, 1]} : vector<2x8x512xf32> to vector<2x1x512xf32>
    %140 = vector.shape_cast %139 : vector<2x1x512xf32> to vector<2x512xf32>
    %cst_25 = arith.constant dense<0.000000e+00> : vector<2x512xf32>
    %141 = tpu.matmul %138, %1, %cst_25 {dimension_numbers = #tpu.dot_dimension_numbers<[1], [0], [0], [1], [0, 0, 1, 1], [], []>} : vector<2x32xf32>, vector<32x512xf32>, vector<2x512xf32> -> vector<2x512xf32>
    %142 = arith.addf %140, %141 : vector<2x512xf32>
    %143 = vector.extract_strided_slice %142 {offsets = [0, 0], sizes = [2, 384], strides = [1, 1]} : vector<2x512xf32> to vector<2x384xf32>
    %144 = arith.negf %143 : vector<2x384xf32>
    %145 = math.exp %144 : vector<2x384xf32>
    %cst_26 = arith.constant 1.000000e+00 : f32
    %146 = vector.broadcast %cst_26 : f32 to vector<2x384xf32>
    %147 = arith.addf %146, %145 : vector<2x384xf32>
    %148 = arith.divf %146, %147 : vector<2x384xf32>
    %149 = vector.extract_strided_slice %148 {offsets = [0, 0], sizes = [2, 128], strides = [1, 1]} : vector<2x384xf32> to vector<2x128xf32>
    %150 = vector.extract_strided_slice %148 {offsets = [0, 128], sizes = [2, 128], strides = [1, 1]} : vector<2x384xf32> to vector<2x128xf32>
    %151 = vector.extract_strided_slice %148 {offsets = [0, 256], sizes = [2, 128], strides = [1, 1]} : vector<2x384xf32> to vector<2x128xf32>
    %152 = vector.extract_strided_slice %142 {offsets = [0, 384], sizes = [2, 128], strides = [1, 1]} : vector<2x512xf32> to vector<2x128xf32>
    %153 = math.tanh %152 : vector<2x128xf32>
    %154 = arith.mulf %150, %135 : vector<2x128xf32>
    %155 = arith.mulf %149, %153 : vector<2x128xf32>
    %156 = arith.addf %154, %155 : vector<2x128xf32>
    %157 = math.tanh %156 : vector<2x128xf32>
    %158 = arith.mulf %151, %157 : vector<2x128xf32>
    %159 = vector.extract_strided_slice %158 {offsets = [0, 0], sizes = [2, 32], strides = [1, 1]} : vector<2x128xf32> to vector<2x32xf32>
    %160 = vector.extract_strided_slice %12 {offsets = [0, 6, 0], sizes = [2, 1, 512], strides = [1, 1, 1]} : vector<2x8x512xf32> to vector<2x1x512xf32>
    %161 = vector.shape_cast %160 : vector<2x1x512xf32> to vector<2x512xf32>
    %cst_27 = arith.constant dense<0.000000e+00> : vector<2x512xf32>
    %162 = tpu.matmul %159, %1, %cst_27 {dimension_numbers = #tpu.dot_dimension_numbers<[1], [0], [0], [1], [0, 0, 1, 1], [], []>} : vector<2x32xf32>, vector<32x512xf32>, vector<2x512xf32> -> vector<2x512xf32>
    %163 = arith.addf %161, %162 : vector<2x512xf32>
    %164 = vector.extract_strided_slice %163 {offsets = [0, 0], sizes = [2, 384], strides = [1, 1]} : vector<2x512xf32> to vector<2x384xf32>
    %165 = arith.negf %164 : vector<2x384xf32>
    %166 = math.exp %165 : vector<2x384xf32>
    %cst_28 = arith.constant 1.000000e+00 : f32
    %167 = vector.broadcast %cst_28 : f32 to vector<2x384xf32>
    %168 = arith.addf %167, %166 : vector<2x384xf32>
    %169 = arith.divf %167, %168 : vector<2x384xf32>
    %170 = vector.extract_strided_slice %169 {offsets = [0, 0], sizes = [2, 128], strides = [1, 1]} : vector<2x384xf32> to vector<2x128xf32>
    %171 = vector.extract_strided_slice %169 {offsets = [0, 128], sizes = [2, 128], strides = [1, 1]} : vector<2x384xf32> to vector<2x128xf32>
    %172 = vector.extract_strided_slice %169 {offsets = [0, 256], sizes = [2, 128], strides = [1, 1]} : vector<2x384xf32> to vector<2x128xf32>
    %173 = vector.extract_strided_slice %163 {offsets = [0, 384], sizes = [2, 128], strides = [1, 1]} : vector<2x512xf32> to vector<2x128xf32>
    %174 = math.tanh %173 : vector<2x128xf32>
    %175 = arith.mulf %171, %156 : vector<2x128xf32>
    %176 = arith.mulf %170, %174 : vector<2x128xf32>
    %177 = arith.addf %175, %176 : vector<2x128xf32>
    %178 = math.tanh %177 : vector<2x128xf32>
    %179 = arith.mulf %172, %178 : vector<2x128xf32>
    %c0_29 = arith.constant 0 : index
    %c0_30 = arith.constant 0 : index
    %180 = vector.load %arg5[%c0_29, %c0_30] : memref<128x16xf32, #tpu.memory_space<vmem>>, vector<128x16xf32>
    %c0_31 = arith.constant 0 : index
    %c0_32 = arith.constant 0 : index
    %181 = vector.load %arg6[%c0_31, %c0_32] : memref<1x16xf32, #tpu.memory_space<vmem>>, vector<1x16xf32>
    %182 = vector.extract_strided_slice %32 {offsets = [0, 0], sizes = [1, 128], strides = [1, 1]} : vector<2x128xf32> to vector<1x128xf32>
    %183 = vector.extract_strided_slice %53 {offsets = [0, 0], sizes = [1, 128], strides = [1, 1]} : vector<2x128xf32> to vector<1x128xf32>
    %184 = vector.extract_strided_slice %74 {offsets = [0, 0], sizes = [1, 128], strides = [1, 1]} : vector<2x128xf32> to vector<1x128xf32>
    %185 = vector.extract_strided_slice %95 {offsets = [0, 0], sizes = [1, 128], strides = [1, 1]} : vector<2x128xf32> to vector<1x128xf32>
    %186 = vector.extract_strided_slice %116 {offsets = [0, 0], sizes = [1, 128], strides = [1, 1]} : vector<2x128xf32> to vector<1x128xf32>
    %187 = vector.extract_strided_slice %137 {offsets = [0, 0], sizes = [1, 128], strides = [1, 1]} : vector<2x128xf32> to vector<1x128xf32>
    %188 = vector.extract_strided_slice %158 {offsets = [0, 0], sizes = [1, 128], strides = [1, 1]} : vector<2x128xf32> to vector<1x128xf32>
    %189 = vector.extract_strided_slice %179 {offsets = [0, 0], sizes = [1, 128], strides = [1, 1]} : vector<2x128xf32> to vector<1x128xf32>
    %190 = tpu.concatenate %182, %183, %184, %185, %186, %187, %188, %189 in 0 : vector<1x128xf32>, vector<1x128xf32>, vector<1x128xf32>, vector<1x128xf32>, vector<1x128xf32>, vector<1x128xf32>, vector<1x128xf32>, vector<1x128xf32> -> vector<8x128xf32>
    %cst_33 = arith.constant dense<0.000000e+00> : vector<8x16xf32>
    %191 = tpu.matmul %190, %180, %cst_33 {dimension_numbers = #tpu.dot_dimension_numbers<[1], [0], [0], [1], [0, 0, 1, 1], [], []>} : vector<8x128xf32>, vector<128x16xf32>, vector<8x16xf32> -> vector<8x16xf32>
    %192 = vector.broadcast %181 : vector<1x16xf32> to vector<8x16xf32>
    %193 = arith.addf %191, %192 : vector<8x16xf32>
    %c0_34 = arith.constant 0 : index
    %c0_35 = arith.constant 0 : index
    %c0_36 = arith.constant 0 : index
    %194 = vector.load %arg7[%c0_34, %c0_35, %c0_36] : memref<2x8x16xf32, #tpu.memory_space<vmem>>, vector<1x8x16xf32>
    %195 = vector.shape_cast %194 : vector<1x8x16xf32> to vector<8x16xf32>
    %196 = vector.shape_cast %193 : vector<8x16xf32> to vector<1x8x16xf32>
    tpu.vector_store %arg7[%c0_34, %c0_35, %c0_36], %196 {strides = array<i32>} : memref<2x8x16xf32, #tpu.memory_space<vmem>>, vector<1x8x16xf32>,
    %197 = vector.extract_strided_slice %32 {offsets = [1, 0], sizes = [1, 128], strides = [1, 1]} : vector<2x128xf32> to vector<1x128xf32>
    %198 = vector.extract_strided_slice %53 {offsets = [1, 0], sizes = [1, 128], strides = [1, 1]} : vector<2x128xf32> to vector<1x128xf32>
    %199 = vector.extract_strided_slice %74 {offsets = [1, 0], sizes = [1, 128], strides = [1, 1]} : vector<2x128xf32> to vector<1x128xf32>
    %200 = vector.extract_strided_slice %95 {offsets = [1, 0], sizes = [1, 128], strides = [1, 1]} : vector<2x128xf32> to vector<1x128xf32>
    %201 = vector.extract_strided_slice %116 {offsets = [1, 0], sizes = [1, 128], strides = [1, 1]} : vector<2x128xf32> to vector<1x128xf32>
    %202 = vector.extract_strided_slice %137 {offsets = [1, 0], sizes = [1, 128], strides = [1, 1]} : vector<2x128xf32> to vector<1x128xf32>
    %203 = vector.extract_strided_slice %158 {offsets = [1, 0], sizes = [1, 128], strides = [1, 1]} : vector<2x128xf32> to vector<1x128xf32>
    %204 = vector.extract_strided_slice %179 {offsets = [1, 0], sizes = [1, 128], strides = [1, 1]} : vector<2x128xf32> to vector<1x128xf32>
    %205 = tpu.concatenate %197, %198, %199, %200, %201, %202, %203, %204 in 0 : vector<1x128xf32>, vector<1x128xf32>, vector<1x128xf32>, vector<1x128xf32>, vector<1x128xf32>, vector<1x128xf32>, vector<1x128xf32>, vector<1x128xf32> -> vector<8x128xf32>
    %cst_37 = arith.constant dense<0.000000e+00> : vector<8x16xf32>
    %206 = tpu.matmul %205, %180, %cst_37 {dimension_numbers = #tpu.dot_dimension_numbers<[1], [0], [0], [1], [0, 0, 1, 1], [], []>} : vector<8x128xf32>, vector<128x16xf32>, vector<8x16xf32> -> vector<8x16xf32>
    %207 = vector.broadcast %181 : vector<1x16xf32> to vector<8x16xf32>
    %208 = arith.addf %206, %207 : vector<8x16xf32>
    %c1 = arith.constant 1 : index
    %c0_38 = arith.constant 0 : index
    %c0_39 = arith.constant 0 : index
    %209 = vector.load %arg7[%c1, %c0_38, %c0_39] : memref<2x8x16xf32, #tpu.memory_space<vmem>>, vector<1x8x16xf32>
    %210 = vector.shape_cast %209 : vector<1x8x16xf32> to vector<8x16xf32>
    %211 = vector.shape_cast %208 : vector<8x16xf32> to vector<1x8x16xf32>
    tpu.vector_store %arg7[%c1, %c0_38, %c0_39], %211 {strides = array<i32>} : memref<2x8x16xf32, #tpu.memory_space<vmem>>, vector<1x8x16xf32>,
    return
  }
}

</mosaic_0001>

<bundles_post_ra>
// kernel: decoder_rnn_forward.1
= control target key start
LH: loop header
LB: loop body
LE: loop exit
PB: predicated region body
PF: predicated region fallthrough
CT: control target
= control target key end

     0   :  { %v2845_v4 = vmov 0.0   ;;  %vm74_vm0 = vcmask 130048   ;;  %s3508_s0 = inlined_call_operand.vmem [shape: f32[2,16], index: 0, kind: input, shape index: {}]   ;;  %s3509_s1 = inlined_call_operand.vmem [shape: f32[2,8,16], index: 1, kind: input, shape index: {}]   ;;  %s3510_s2 = inlined_call_operand.vmem [shape: f32[16,512], index: 2, kind: input, shape index: {}]   ;;  %s3511_s3 = inlined_call_operand.vmem [shape: f32[32,512], index: 3, kind: input, shape index: {}]   ;;  %s3512_s4 = inlined_call_operand.vmem [shape: f32[1,512], index: 4, kind: input, shape index: {}]   ;;  %s3513_s5 = inlined_call_operand.vmem [shape: f32[128,16], index: 5, kind: input, shape index: {}]   ;;  %s3514_s6 = inlined_call_operand.vmem [shape: f32[1,16], index: 6, kind: input, shape index: {}]   ;;  %s3515_s7 = inlined_call_operand.hbm [shape: f32[2,8,16], index: 7, kind: output, shape index: {}]  }
   0x1   :  { %v32_v0 = vld [vmem:[%s3510_s2 + $0x28] sm:$0xff]  ;;  %v31_v1 = vld [vmem:[%s3510_s2 + $0x20] sm:$0xff]  ;;  %142 = vmatprep.mubr.f32.mxu0 %v2845_v4  ;;  %v34_v5 = vld [vmem:[%s3510_s2 + $0x38] sm:$0xff]  ;;  %213 = vmatprep.mubr.f32.mxu1 %v2845_v4 }
   0x2   :  { %v28_v2 = vld [vmem:[%s3510_s2 + $0x8] sm:$0xff]  ;;  %106 = vmatprep.subr.mxu0 %v32_v0  ;;  %v27_v3 = vld [vmem:[%s3510_s2] sm:$0xff]  ;;  %177 = vmatprep.subr.mxu1 %v34_v5  ;;  %v33_v7 = vld [vmem:[%s3510_s2 + $0x30] sm:$0xff] }
   0x3   :  { %107 = vmatpush1.msra.mxu0 %v31_v1  ;;  %v52_v6 = vld [vmem:[%s3508_s0] sm:$0x3]  ;;  %178 = vmatpush1.msra.mxu1 %v33_v7  ;;  %v30_v8 = vld [vmem:[%s3510_s2 + $0x18] sm:$0xff]  ;;  %v29_v9 = vld [vmem:[%s3510_s2 + $0x10] sm:$0xff] }
   0x4   :  { %108 = vmatprep.subr.mxu0 %v28_v2  ;;  %179 = vmatprep.subr.mxu1 %v30_v8  ;;  %v220_v10 = vld [vmem:[%s3509_s1] sm:$0xff]  ;;  %v2926_v11 = vld [vmem:[%s3511_s3 + $0x68] sm:$0xff] }
   0x5   :  { %109 = vmatpush1.msra.mxu0 %v27_v3  ;;  %v2931_v12 = vld [vmem:[%s3511_s3 + $0x60] sm:$0xff]  ;;  %180 = vmatpush1.msra.mxu1 %v29_v9  ;;  %v2937_v13 = vld [vmem:[%s3511_s3 + $0x48] sm:$0xff] }
   0x6   :  { %2392 = vmatmul.mubr.msk.f32.vlgmr.msra.gmra.mxu0 %vm74_vm0, %v52_v6  ;;  %256 = vmatprep.subr.mxu0 %v32_v0  ;;  %v2944_v14 = vld [vmem:[%s3511_s3 + $0x40] sm:$0xff] }
   0x7   :  { %257 = vmatpush1.msra.mxu0 %v31_v1  ;;  %292 = vmatprep.mubr.f32.mxu0 %v2845_v4 }
   0x8   :  { %258 = vmatprep.subr.mxu0 %v28_v2 }
   0x9   :  { %259 = vmatpush1.msra.mxu0 %v27_v3 }
   0xa   :  { %2394 = vmatmul.mubr.msk.f32.vlgmr.msra.gmra.mxu0 %vm74_vm0, %v220_v10  ;;  %410 = vmatprep.subr.mxu0 %v2926_v11 }
   0xb   :  { %12 = vsyncpa [#allocation3], 0  ;;  %411 = vmatpush1.msra.mxu0 %v2931_v12  ;;  %2393 = vmatmul.mubr.msk.f32.vlgmr.msra.gmra.mxu1 %vm74_vm0, %v52_v6  ;;  %v221_v15 = vld [vmem:[%s3509_s1 + $0x8] sm:$0xff]  ;;  %v2962_v17 = vld [vmem:[%s3511_s3 + $0x20] sm:$0xff]  ;;  %v54_v28 = vlaneseq  ;;  %vm382_vm1 = vcmask 261120   ;;  %vm780_vm2 = vcmask 1041409  }
   0xc   :  { %412 = vmatprep.subr.mxu0 %v2937_v13  ;;  %298 = vmatprep.mubr.f32.mxu0 %v2845_v4  ;;  %v2956_v16 = vld [vmem:[%s3511_s3 + $0x28] sm:$0xff]  ;;  %v2974_v19 = vld [vmem:[%s3511_s3] sm:$0xff]  ;;  %v2980_v20 = vld [vmem:[%s3511_s3 + $0x78] sm:$0xff]  ;;  %vm2190_vm3 = vcmask 1040384   ;;  %vm2192_vm4 = vcmask 1041408   ;;  %vm2194_vm5 = vcmask 1042432  }
   0xd   :  { %333 = vmatprep.subr.mxu1 %v34_v5  ;;  %413 = vmatpush1.msra.mxu0 %v2944_v14  ;;  %v2968_v18 = vld [vmem:[%s3511_s3 + $0x8] sm:$0xff]  ;;  %v2987_v21 = vld [vmem:[%s3511_s3 + $0x70] sm:$0xff]  ;;  %v2994_v22 = vld [vmem:[%s3511_s3 + $0x58] sm:$0xff]  ;;  %v55_v29 = vshrl.u32 %v54_v28, 7  ;;  %vm2196_vm6 = vcmask 1043456   ;;  %vm2198_vm7 = vcmask 1044480  }
   0xe   :  { %2395 = vmatmul.mubr.msk.f32.gmra.mxu0 %vm74_vm0, %v221_v15  ;;  %334 = vmatpush1.msra.mxu1 %v33_v7  ;;  %v3001_v23 = vld [vmem:[%s3511_s3 + $0x50] sm:$0xff]  ;;  %v3008_v24 = vld [vmem:[%s3511_s3 + $0x38] sm:$0xff]  ;;  %v51_v31 = vld [vmem:[%s3512_s4] sm:$0xf]  ;;  %vm2200_vm8 = vcmask 1045504   ;;  %vm2846_vm9 = vmmov 0  }
   0xf   :  { %414 = vmatprep.subr.mxu0 %v2956_v16  ;;  %335 = vmatprep.subr.mxu1 %v30_v8  ;;  %v3015_v25 = vld [vmem:[%s3511_s3 + $0x30] sm:$0xff]  ;;  %v3021_v26 = vld [vmem:[%s3511_s3 + $0x18] sm:$0xff]  ;;  %v56_v30 = vsub.s32 0, %v55_v29  ;;  %v60_v33 = vsub.s32 1, %v55_v29  ;;  %v64_v42 = vsub.s32 2, %v55_v29  ;;  %v68_v46 = vsub.s32 3, %v55_v29 }
  0x10   :  { %415 = vmatpush1.msra.mxu0 %v2962_v17  ;;  %336 = vmatpush1.msra.mxu1 %v29_v9  ;;  %v3029_v27 = vld [vmem:[%s3511_s3 + $0x10] sm:$0xff]  ;;  %vm2202_vm10 = vcmask 1046528   ;;  %s2847_s13 = smov [#allocation2]  }
  0x11   :  { %369 = vmatprep.mubr.f32.mxu1 %v2845_v4  ;;  %416 = vmatprep.subr.mxu0 %v2968_v18  ;;  %v57_v35 = vrot.slane %v51_v31, %v56_v30  ;;  %v61_v37 = vrot.slane %v51_v31, %v60_v33  ;;  %v65_v48 = vrot.slane %v51_v31, %v64_v42  ;;  %s2381_s14 = sshll.u32 %s2847_s13, 4  ;;  %s2382_s14 = int_to_ptr.vmem [resolvable:$true] %s2381_s14 }
  0x12   :  { %2396 = vmatmul.mubr.msk.f32.vlgmr.msra.gmra.mxu1 %vm74_vm0, %v220_v10  ;;  %417 = vmatpush1.msra.mxu0 %v2974_v19  ;;  %v69_v52 = vrot.slane %v51_v31, %v68_v46  ;;  %s2823_s15 = scalar_lea.vmem %s2382_s14, 256  ;;  %p2828_p1 = scmp.lt.s32.totalorder %s2382_s14, %s2382_s14 }
  0x13   :  { %450 = vmatprep.mubr.f32.mxu0 %v2845_v4  ;;  %481 = vmatprep.subr.mxu1 %v2980_v20  ;;  %p2824_p0 = scmp.ne.s32.totalorder %s2382_s14, %s2823_s15  ;;  %p2829_p2 = scmp.lt.s32.totalorder %s2823_s15, %s2823_s15 }
  0x14   :  { %451 = vmatmul.mubr.f32.vlgmr.msra.gmra.mxu0 %v2845_v4  ;;  %482 = vmatpush1.msra.mxu1 %v2987_v21 }
  0x15   :  { %483 = vmatprep.subr.mxu1 %v2994_v22  ;;  %375 = vmatprep.mubr.f32.mxu1 %v2845_v4  ;;  %p2830_p3 = por %p2829_p2, %p2828_p1 }
  0x16   :  { %484 = vmatpush1.msra.mxu1 %v3001_v23  ;;  %583 = vmatprep.subr.mxu0 %v2926_v11 }
  0x17   :  { %2397 = vmatmul.mubr.msk.f32.gmra.mxu1 %vm74_vm0, %v221_v15  ;;  %485 = vmatprep.subr.mxu1 %v3008_v24  ;;  %p2831_p4 = pnand %p2830_p3, %p2824_p0 }
  0x18   :  { %486 = vmatpush1.msra.mxu1 %v3015_v25  ;;  %521 = vmatprep.mubr.f32.mxu1 %v2845_v4 }
  0x19   :  { %487 = vmatprep.subr.mxu1 %v3021_v26  ;;  %584 = vmatpush1.msra.mxu0 %v2931_v12 }
  0x1a   :  { %488 = vmatpush1.msra.mxu1 %v3029_v27  ;;  %585 = vmatprep.subr.mxu0 %v2937_v13 }
  0x1b   :  { %522 = vmatmul.mubr.f32.vlgmr.msra.gmra.mxu1 %v2845_v4  ;;  %654 = vmatprep.subr.mxu1 %v2980_v20 }
  0x1c   :  { %655 = vmatpush1.msra.mxu1 %v2987_v21  ;;  %586 = vmatpush1.msra.mxu0 %v2944_v14 }
  0x1d   :  { %656 = vmatprep.subr.mxu1 %v2994_v22  ;;  %587 = vmatprep.subr.mxu0 %v2956_v16 }
  0x1e   :  { %657 = vmatpush1.msra.mxu1 %v3001_v23  ;;  %588 = vmatpush1.msra.mxu0 %v2962_v17 }
  0x1f   :  { %658 = vmatprep.subr.mxu1 %v3008_v24  ;;  %589 = vmatprep.subr.mxu0 %v2968_v18 }
  0x20   :  { %659 = vmatpush1.msra.mxu1 %v3015_v25  ;;  %590 = vmatpush1.msra.mxu0 %v2974_v19 }
  0x21   :  { %660 = vmatprep.subr.mxu1 %v3021_v26  ;;  %623 = vmatprep.mubr.f32.mxu0 %v2845_v4 }
  0x22   :  { %661 = vmatpush1.msra.mxu1 %v3029_v27  ;;  %694 = vmatprep.mubr.f32.mxu1 %v2845_v4 }
  0x23   :  { %808 = vmatprep.subr.mxu0 %v2926_v11  ;;  %879 = vmatprep.subr.mxu1 %v2980_v20 }
  0xc6   :  { %v144_v32 = vpop.f32.mrf.mxu0 }
  0xc7   :  { %v145_v51 = vadd.f32 %v144_v32, %v57_v35 }
  0xc8   :  { %v146_v34 = vpop.f32.mrf.mxu0 }
  0xc9   :  { %v147_v56 = vadd.f32 %v146_v34, %v61_v37 }
  0xca   :  { %v294_v36 = vpop.f32.mrf.mxu0 }
  0xcb   :  { %v3058_v38 = vadd.f32 %v294_v36, %v57_v35  ;;  %v215_v39 = vpop.f32.mrf.mxu1 }
  0xcc   :  { %v296_v40 = vpop.f32.mrf.mxu0  ;;  %v216_v3 = vadd.f32 %v215_v39, %v65_v48 }
  0xcd   :  { %v3060_v41 = vadd.f32 %v296_v40, %v61_v37  ;;  %v217_v44 = vpop.f32.mrf.mxu1 }
  0xce   :  { %v300_v43 = vpop.f32.mrf.mxu0  ;;  %v218_v7 = vadd.f32 %v217_v44, %v69_v52 }
  0xcf   :  { %v3062_v45 = vadd.f32 %v300_v43, %v57_v35 }
  0xd0   :  { %v302_v47 = vpop.f32.mrf.mxu0 }
  0xd1   :  { %v3064_v49 = vadd.f32 %v302_v47, %v61_v37 }
  0xd2   :  { %v371_v50 = vpop.f32.mrf.mxu1 }
  0xd3   :  { %v3066_v53 = vadd.f32 %v371_v50, %v65_v48 }
  0xd4   :  { %v452_v54 = vpop.f32.mrf.mxu0  ;;  %v373_v55 = vpop.f32.mrf.mxu1 }
  0xd5   :  { %v528_v57 = vadd.f32 %v452_v54, %v145_v51  ;;  %v3068_v58 = vadd.f32 %v373_v55, %v69_v52 }
  0xd6   :  { %v454_v59 = vpop.f32.mrf.mxu0 }
  0xd7   :  { %v2398_v60 = vmul.f32 -1.442695, %v528_v57  ;;  %v529_v61 = vadd.f32 %v454_v59, %v147_v56  ;;  %v377_v62 = vpop.f32.mrf.mxu1 }
  0xd8   :  { %v3070_v63 = vadd.f32 %v377_v62, %v65_v48 }
  0xd9   :  { %2567 = vpow2.f32 %v2398_v60  ;;  %v2399_v0 = vmul.f32 -1.442695, %v529_v61  ;;  %v379_v1 = vpop.f32.mrf.mxu1 }
  0xda   :  { %v3072_v2 = vadd.f32 %v379_v1, %v69_v52 }
  0xdb   :  { %2569 = vpow2.f32 %v2399_v0  ;;  %v523_v5 = vpop.f32.mrf.mxu1 }
  0xdc   :  { %v530_v6 = vadd.f32 %v523_v5, %v216_v3 }
  0xdd   :  { %v525_v8 = vpop.f32.mrf.mxu1 }
  0xde   :  { %v2400_v9 = vmul.f32 -1.442695, %v530_v6  ;;  %v531_v15 = vadd.f32 %v525_v8, %v218_v7 }
  0xe0   :  { %2571 = vpow2.f32 %v2400_v9 }
  0xe6   :  { %v2568_v10 = vpop.eup %2567 }
  0xe7   :  { %v541_v28 = vadd.f32 1.0, %v2568_v10 }
  0xe8   :  { %v2570_v29 = vpop.eup %2569 }
  0xe9   :  { %2573 = vrcp.f32 %v541_v28  ;;  %v542_v30 = vadd.f32 1.0, %v2570_v29 }
  0xea   :  { %2575 = vtanh.f32 %v531_v15 }
  0xeb   :  { %2577 = vrcp.f32 %v542_v30 }
  0xed   :  { %v2572_v31 = vpop.eup %2571 }
  0xee   :  { %v543_v35 = vadd.f32 1.0, %v2572_v31 }
  0xf0   :  { %2579 = vrcp.f32 %v543_v35 }
  0xf6   :  { %v2574_v32 = vpop.eup %2573 }
  0xf7   :  { %v2576_v33 = vpop.eup %2575 }
  0xf8   :  { %v2578_v34 = vpop.eup %2577  ;;  %v552_v37 = vmul.f32 %v2576_v33, %v2574_v32 }
  0xf9   :  { %v551_v36 = vmul.f32 0.0, %v2578_v34 }
  0xfb   :  { %v3074_v39 = vadd.f32 %v552_v37, %v551_v36 }
  0xfd   :  { %2581 = vtanh.f32 %v3074_v39  ;;  %v2580_v40 = vpop.eup %2579 }
 0x10a   :  { %v2582_v42 = vpop.eup %2581 }
 0x10b   :  { %v3077_v43 = vmul.f32 %v2582_v42, %v2580_v40 }
 0x10d   :  { %2401 = vmatmul.mubr.msk.f32.vlgmr.msra.gmra.mxu0 %vm382_vm1, %v3077_v43  ;;  %2402 = vmatmul.mubr.msk.f32.vlgmr.msra.gmra.mxu1 %vm382_vm1, %v3077_v43 }
 0x10e   :  { %809 = vmatpush1.msra.mxu0 %v2931_v12  ;;  %880 = vmatpush1.msra.mxu1 %v2987_v21 }
 0x10f   :  { %810 = vmatprep.subr.mxu0 %v2937_v13  ;;  %881 = vmatprep.subr.mxu1 %v2994_v22 }
 0x110   :  { %811 = vmatpush1.msra.mxu0 %v2944_v14  ;;  %882 = vmatpush1.msra.mxu1 %v3001_v23 }
 0x111   :  { %812 = vmatprep.subr.mxu0 %v2956_v16  ;;  %883 = vmatprep.subr.mxu1 %v3008_v24 }
 0x112   :  { %813 = vmatpush1.msra.mxu0 %v2962_v17  ;;  %884 = vmatpush1.msra.mxu1 %v3015_v25 }
 0x113   :  { %814 = vmatprep.subr.mxu0 %v2968_v18  ;;  %885 = vmatprep.subr.mxu1 %v3021_v26 }
 0x114   :  { %815 = vmatpush1.msra.mxu0 %v2974_v19  ;;  %848 = vmatprep.mubr.f32.mxu0 %v2845_v4 }
 0x115   :  { %886 = vmatpush1.msra.mxu1 %v3029_v27  ;;  %919 = vmatprep.mubr.f32.mxu1 %v2845_v4 }
 0x116   :  { %1034 = vmatprep.subr.mxu0 %v2926_v11  ;;  %1105 = vmatprep.subr.mxu1 %v2980_v20 }
 0x1cd   :  { %v625_v44 = vpop.f32.mrf.mxu0  ;;  %v696_v56 = vpop.f32.mrf.mxu1 }
 0x1ce   :  { %v705_v46 = vrot.slane %v625_v44, 1  ;;  %v717_v47 = vadd.f32 %v625_v44, %v3058_v38  ;;  %v707_v60 = vrot.slane %v696_v56, 1  ;;  %v719_v62 = vadd.f32 %v696_v56, %v3066_v53 }
 0x1cf   :  { %v627_v48 = vpop.f32.mrf.mxu0  ;;  %v698_v0 = vpop.f32.mrf.mxu1  ;;  %v764_v44 = vrot.slane %v3074_v39, 1 }
 0x1d0   :  { %v721_v50 = vadd.f32 %v705_v46, %v3062_v45  ;;  %v2403_v51 = vmul.f32 -1.442695, %v717_v47  ;;  %v706_v52 = vrot.slane %v627_v48, 1  ;;  %v718_v54 = vadd.f32 %v627_v48, %v3060_v41 }
 0x1d1   :  { %v723_v1 = vadd.f32 %v707_v60, %v3070_v63  ;;  %v708_v3 = vrot.slane %v698_v0, 1  ;;  %v2405_v5 = vmul.f32 -1.442695, %v719_v62  ;;  %v720_v7 = vadd.f32 %v698_v0, %v3068_v58 }
 0x1d2   :  { %2583 = vpow2.f32 %v2403_v51  ;;  %v2406_v55 = vmul.f32 -1.442695, %v721_v50  ;;  %v722_v57 = vadd.f32 %v706_v52, %v3064_v49  ;;  %v2404_v59 = vmul.f32 -1.442695, %v718_v54 }
 0x1d3   :  { %v2408_v6 = vmul.f32 -1.442695, %v723_v1  ;;  %v724_v9 = vadd.f32 %v708_v3, %v3072_v2 }
 0x1d4   :  { %2585 = vpow2.f32 %v2406_v55  ;;  %v2407_v61 = vmul.f32 -1.442695, %v722_v57 }
 0x1d5   :  { %2587 = vpow2.f32 %v2404_v59 }
 0x1d6   :  { %2589 = vpow2.f32 %v2407_v61 }
 0x1d7   :  { %2591 = vpow2.f32 %v2405_v5 }
 0x1d8   :  { %2593 = vpow2.f32 %v2408_v6 }
 0x1d9   :  { %2595 = vtanh.f32 %v720_v7 }
 0x1da   :  { %2597 = vtanh.f32 %v724_v9 }
 0x1df   :  { %v2584_v8 = vpop.eup %2583 }
 0x1e0   :  { %v743_v10 = vadd.f32 1.0, %v2584_v8 }
 0x1e1   :  { %v2586_v15 = vpop.eup %2585 }
 0x1e2   :  { %v746_v28 = vadd.f32 1.0, %v2586_v15  ;;  %v2588_v29 = vpop.eup %2587  ;;  %2599 = vrcp.f32 %v743_v10 }
 0x1e3   :  { %v2590_v30 = vpop.eup %2589  ;;  %v744_v31 = vadd.f32 1.0, %v2588_v29 }
 0x1e4   :  { %2601 = vrcp.f32 %v746_v28  ;;  %v747_v32 = vadd.f32 1.0, %v2590_v30  ;;  %v2592_v33 = vpop.eup %2591 }
 0x1e5   :  { %2603 = vrcp.f32 %v744_v31  ;;  %v2594_v34 = vpop.eup %2593  ;;  %v745_v55 = vadd.f32 1.0, %v2592_v33 }
 0x1e6   :  { %2605 = vrcp.f32 %v747_v32  ;;  %v2596_v35 = vpop.eup %2595  ;;  %v748_v46 = vadd.f32 1.0, %v2594_v34 }
 0x1e7   :  { %v2598_v36 = vpop.eup %2597 }
 0x1e8   :  { %2607 = vrcp.f32 %v748_v46 }
 0x1ef   :  { %v2600_v37 = vpop.eup %2599 }
 0x1f0   :  { %v769_v50 = vmul.f32 %v2600_v37, %v2596_v35 }
 0x1f1   :  { %v2602_v40 = vpop.eup %2601 }
 0x1f2   :  { %v2604_v42 = vpop.eup %2603  ;;  %v770_v52 = vmul.f32 %v2602_v40, %v2598_v36 }
 0x1f3   :  { %v2606_v47 = vpop.eup %2605  ;;  %v767_v48 = vmul.f32 %v2604_v42, %v3074_v39 }
 0x1f4   :  { %v768_v51 = vmul.f32 %v2606_v47, %v764_v44 }
 0x1f5   :  { %v3111_v54 = vadd.f32 %v769_v50, %v767_v48  ;;  %v2608_v57 = vpop.eup %2607 }
 0x1f6   :  { %v3113_v56 = vadd.f32 %v770_v52, %v768_v51 }
 0x1f7   :  { %2609 = vtanh.f32 %v3111_v54 }
 0x1f8   :  { %2611 = vtanh.f32 %v3113_v56 }
 0x1f9   :  { %2613 = vrcp.f32 %v745_v55 }
 0x204   :  { %v2610_v59 = vpop.eup %2609 }
 0x205   :  { %v2612_v60 = vpop.eup %2611 }
 0x206   :  { %v3117_v61 = vmul.f32 %v2612_v60, %v2608_v57  ;;  %v2614_v39 = vpop.eup %2613 }
 0x207   :  { %v3119_v62 = vmul.f32 %v2614_v39, %v2610_v59 }
 0x208   :  { %v779_v0 = vrot.slane %v3117_v61, 7 }
 0x20a   :  { %v781_v1 = vsel %vm780_vm2, %v779_v0, %v3119_v62 }
 0x20b   :  { %2409 = vmatmul.mubr.msk.f32.vlgmr.msra.gmra.mxu0 %vm382_vm1, %v781_v1  ;;  %2410 = vmatmul.mubr.msk.f32.vlgmr.msra.gmra.mxu1 %vm382_vm1, %v781_v1 }
 0x20c   :  { %1035 = vmatpush1.msra.mxu0 %v2931_v12  ;;  %1106 = vmatpush1.msra.mxu1 %v2987_v21 }
 0x20d   :  { %1036 = vmatprep.subr.mxu0 %v2937_v13  ;;  %1107 = vmatprep.subr.mxu1 %v2994_v22 }
 0x20e   :  { %1037 = vmatpush1.msra.mxu0 %v2944_v14  ;;  %1108 = vmatpush1.msra.mxu1 %v3001_v23 }
 0x20f   :  { %1038 = vmatprep.subr.mxu0 %v2956_v16  ;;  %1109 = vmatprep.subr.mxu1 %v3008_v24 }
 0x210   :  { %1039 = vmatpush1.msra.mxu0 %v2962_v17  ;;  %1110 = vmatpush1.msra.mxu1 %v3015_v25 }
 0x211   :  { %1040 = vmatprep.subr.mxu0 %v2968_v18  ;;  %1111 = vmatprep.subr.mxu1 %v3021_v26 }
 0x212   :  { %1041 = vmatpush1.msra.mxu0 %v2974_v19  ;;  %1074 = vmatprep.mubr.f32.mxu0 %v2845_v4 }
 0x213   :  { %1112 = vmatpush1.msra.mxu1 %v3029_v27  ;;  %1145 = vmatprep.mubr.f32.mxu1 %v2845_v4 }
 0x214   :  { %1265 = vmatprep.subr.mxu0 %v2926_v11  ;;  %1336 = vmatprep.subr.mxu1 %v2980_v20 }
 0x2cb   :  { %v850_v3 = vpop.f32.mrf.mxu0  ;;  %v921_v29 = vpop.f32.mrf.mxu1 }
 0x2cc   :  { %v930_v5 = vrot.slane %v850_v3, 7  ;;  %v946_v6 = vadd.f32 %v850_v3, %v3062_v45  ;;  %v932_v32 = vrot.slane %v921_v29, 7  ;;  %v948_v35 = vadd.f32 %v921_v29, %v3070_v63 }
 0x2cd   :  { %v852_v7 = vpop.f32.mrf.mxu0  ;;  %v923_v34 = vpop.f32.mrf.mxu1 }
 0x2ce   :  { %v942_v8 = vadd.f32 %v930_v5, %v3058_v38  ;;  %v2414_v9 = vmul.f32 -1.442695, %v946_v6  ;;  %v931_v10 = vrot.slane %v852_v7, 7  ;;  %v947_v15 = vadd.f32 %v852_v7, %v3064_v49 }
 0x2cf   :  { %v944_v36 = vadd.f32 %v932_v32, %v3066_v53  ;;  %v933_v37 = vrot.slane %v923_v34, 7  ;;  %v2416_v40 = vmul.f32 -1.442695, %v948_v35  ;;  %v949_v47 = vadd.f32 %v923_v34, %v3072_v2 }
 0x2d0   :  { %v2411_v28 = vmul.f32 -1.442695, %v942_v8  ;;  %2615 = vpow2.f32 %v2414_v9  ;;  %v943_v30 = vadd.f32 %v931_v10, %v3060_v41  ;;  %v2415_v31 = vmul.f32 -1.442695, %v947_v15 }
 0x2d1   :  { %v2413_v42 = vmul.f32 -1.442695, %v944_v36  ;;  %v945_v44 = vadd.f32 %v933_v37, %v3068_v58  ;;  %v991_v8 = vrot.slane %v3113_v56, 7  ;;  %v990_v10 = vrot.slane %v3111_v54, 7 }
 0x2d2   :  { %2617 = vpow2.f32 %v2411_v28  ;;  %v2412_v33 = vmul.f32 -1.442695, %v943_v30  ;;  %v2175_v37 = vrot.slane %v3119_v62, 7 }
 0x2d3   :  { %2619 = vpow2.f32 %v2415_v31 }
 0x2d4   :  { %2621 = vpow2.f32 %v2412_v33 }
 0x2d5   :  { %2623 = vpow2.f32 %v2416_v40 }
 0x2d6   :  { %2625 = vpow2.f32 %v2413_v42  ;;  %v2281_v42 = vrot.slane %v3077_v43, 1 }
 0x2d7   :  { %2627 = vtanh.f32 %v945_v44 }
 0x2d8   :  { %2629 = vtanh.f32 %v949_v47  ;;  %v2297_v47 = vsel %vm2190_vm3, %v2281_v42, %v779_v0 }
 0x2dd   :  { %v2616_v46 = vpop.eup %2615 }
 0x2de   :  { %v971_v48 = vadd.f32 1.0, %v2616_v46 }
 0x2df   :  { %v2618_v50 = vpop.eup %2617 }
 0x2e0   :  { %v968_v51 = vadd.f32 1.0, %v2618_v50  ;;  %v2620_v52 = vpop.eup %2619  ;;  %2631 = vrcp.f32 %v971_v48 }
 0x2e1   :  { %v2622_v55 = vpop.eup %2621  ;;  %v972_v57 = vadd.f32 1.0, %v2620_v52 }
 0x2e2   :  { %2633 = vrcp.f32 %v968_v51  ;;  %v969_v59 = vadd.f32 1.0, %v2622_v55  ;;  %v2624_v60 = vpop.eup %2623  ;;  %v2191_v51 = vsel %vm2190_vm3, %v3077_v43, %v2175_v37 }
 0x2e3   :  { %2635 = vrcp.f32 %v972_v57  ;;  %v2626_v39 = vpop.eup %2625  ;;  %v973_v7 = vadd.f32 1.0, %v2624_v60 }
 0x2e4   :  { %2637 = vrcp.f32 %v969_v59  ;;  %v2628_v1 = vpop.eup %2627  ;;  %v970_v15 = vadd.f32 1.0, %v2626_v39 }
 0x2e5   :  { %v2630_v3 = vpop.eup %2629  ;;  %2639 = vrcp.f32 %v973_v7 }
 0x2e6   :  { %2641 = vrcp.f32 %v970_v15 }
 0x2ed   :  { %v2632_v5 = vpop.eup %2631 }
 0x2ee   :  { %v997_v30 = vmul.f32 %v2632_v5, %v2630_v3 }
 0x2ef   :  { %v2634_v6 = vpop.eup %2633 }
 0x2f0   :  { %v2636_v9 = vpop.eup %2635  ;;  %v996_v32 = vmul.f32 %v2634_v6, %v2628_v1 }
 0x2f1   :  { %v2638_v28 = vpop.eup %2637  ;;  %v995_v29 = vmul.f32 %v2636_v9, %v991_v8 }
 0x2f2   :  { %v994_v31 = vmul.f32 %v2638_v28, %v990_v10  ;;  %v2640_v56 = vpop.eup %2639 }
 0x2f3   :  { %v3156_v33 = vadd.f32 %v997_v30, %v995_v29  ;;  %v2642_v35 = vpop.eup %2641 }
 0x2f4   :  { %v3158_v34 = vadd.f32 %v996_v32, %v994_v31 }
 0x2f5   :  { %2643 = vtanh.f32 %v3156_v33 }
 0x2f6   :  { %2645 = vtanh.f32 %v3158_v34 }
 0x302   :  { %v2644_v36 = vpop.eup %2643 }
 0x303   :  { %v2646_v54 = vpop.eup %2645  ;;  %v1003_v40 = vmul.f32 %v2644_v36, %v2640_v56 }
 0x304   :  { %v1002_v44 = vmul.f32 %v2646_v54, %v2642_v35 }
 0x305   :  { %v2284_v46 = vrot.slane %v1003_v40, 7 }
 0x306   :  { %v1006_v48 = vrot.slane %v1002_v44, 1  ;;  %v2177_v50 = vrot.slane %v1002_v44, 7 }
 0x307   :  { %v3167_v52 = vsel %vm2192_vm4, %v2297_v47, %v2284_v46 }
 0x308   :  { %v1007_v55 = vsel %vm780_vm2, %v1003_v40, %v1006_v48  ;;  %v3170_v57 = vsel %vm2192_vm4, %v2191_v51, %v2177_v50 }
 0x309   :  { %2417 = vmatmul.mubr.msk.f32.vlgmr.msra.gmra.mxu0 %vm382_vm1, %v1007_v55  ;;  %2418 = vmatmul.mubr.msk.f32.vlgmr.msra.gmra.mxu1 %vm382_vm1, %v1007_v55 }
 0x30a   :  { %1266 = vmatpush1.msra.mxu0 %v2931_v12  ;;  %1337 = vmatpush1.msra.mxu1 %v2987_v21 }
 0x30b   :  { %1267 = vmatprep.subr.mxu0 %v2937_v13  ;;  %1338 = vmatprep.subr.mxu1 %v2994_v22 }
 0x30c   :  { %1268 = vmatpush1.msra.mxu0 %v2944_v14  ;;  %1339 = vmatpush1.msra.mxu1 %v3001_v23 }
 0x30d   :  { %1269 = vmatprep.subr.mxu0 %v2956_v16  ;;  %1340 = vmatprep.subr.mxu1 %v3008_v24 }
 0x30e   :  { %1270 = vmatpush1.msra.mxu0 %v2962_v17  ;;  %1341 = vmatpush1.msra.mxu1 %v3015_v25 }
 0x30f   :  { %1271 = vmatprep.subr.mxu0 %v2968_v18  ;;  %1342 = vmatprep.subr.mxu1 %v3021_v26 }
 0x310   :  { %1272 = vmatpush1.msra.mxu0 %v2974_v19  ;;  %1305 = vmatprep.mubr.f32.mxu0 %v2845_v4 }
 0x311   :  { %1343 = vmatpush1.msra.mxu1 %v3029_v27  ;;  %1376 = vmatprep.mubr.f32.mxu1 %v2845_v4 }
 0x312   :  { %1496 = vmatprep.subr.mxu0 %v2926_v11  ;;  %1567 = vmatprep.subr.mxu1 %v2980_v20 }
 0x3c9   :  { %v1076_v43 = vpop.f32.mrf.mxu0  ;;  %v1147_v6 = vpop.f32.mrf.mxu1 }
 0x3ca   :  { %v1156_v61 = vrot.slane %v1076_v43, 6  ;;  %v1160_v62 = vrot.slane %v1076_v43, 7  ;;  %v1158_v15 = vrot.slane %v1147_v6, 6  ;;  %v1162_v28 = vrot.slane %v1147_v6, 7 }
 0x3cb   :  { %v1078_v0 = vpop.f32.mrf.mxu0  ;;  %v1149_v29 = vpop.f32.mrf.mxu1 }
 0x3cc   :  { %v1172_v59 = vadd.f32 %v1156_v61, %v3058_v38  ;;  %v1176_v60 = vadd.f32 %v1160_v62, %v3062_v45  ;;  %v1157_v39 = vrot.slane %v1078_v0, 6  ;;  %v1161_v1 = vrot.slane %v1078_v0, 7 }
 0x3cd   :  { %v1174_v30 = vadd.f32 %v1158_v15, %v3066_v53  ;;  %v1178_v31 = vadd.f32 %v1162_v28, %v3070_v63  ;;  %v1159_v32 = vrot.slane %v1149_v29, 6  ;;  %v1163_v56 = vrot.slane %v1149_v29, 7 }
 0x3ce   :  { %v2419_v3 = vmul.f32 -1.442695, %v1172_v59  ;;  %v2422_v5 = vmul.f32 -1.442695, %v1176_v60  ;;  %v1173_v7 = vadd.f32 %v1157_v39, %v3060_v41  ;;  %v1177_v8 = vadd.f32 %v1161_v1, %v3064_v49 }
 0x3cf   :  { %v2421_v35 = vmul.f32 -1.442695, %v1174_v30  ;;  %v2424_v36 = vmul.f32 -1.442695, %v1178_v31  ;;  %v1175_v54 = vadd.f32 %v1159_v32, %v3068_v58  ;;  %v1179_v40 = vadd.f32 %v1163_v56, %v3072_v2 }
 0x3d0   :  { %2647 = vpow2.f32 %v2419_v3  ;;  %v2420_v9 = vmul.f32 -1.442695, %v1173_v7  ;;  %v2423_v10 = vmul.f32 -1.442695, %v1177_v8  ;;  %v1220_v60 = vrot.slane %v3158_v34, 7 }
 0x3d1   :  { %2649 = vpow2.f32 %v2422_v5  ;;  %v1221_v3 = vrot.slane %v3156_v33, 7 }
 0x3d2   :  { %2651 = vpow2.f32 %v2420_v9 }
 0x3d3   :  { %2653 = vpow2.f32 %v2423_v10 }
 0x3d4   :  { %2655 = vpow2.f32 %v2421_v35 }
 0x3d5   :  { %2657 = vpow2.f32 %v2424_v36 }
 0x3d6   :  { %2659 = vtanh.f32 %v1175_v54 }
 0x3d7   :  { %2661 = vtanh.f32 %v1179_v40 }
 0x3dd   :  { %v2648_v37 = vpop.eup %2647 }
 0x3de   :  { %v2650_v42 = vpop.eup %2649  ;;  %v1198_v44 = vadd.f32 1.0, %v2648_v37 }
 0x3df   :  { %v1201_v46 = vadd.f32 1.0, %v2650_v42  ;;  %v2652_v47 = vpop.eup %2651 }
 0x3e0   :  { %v2654_v48 = vpop.eup %2653  ;;  %2663 = vrcp.f32 %v1198_v44  ;;  %v1199_v50 = vadd.f32 1.0, %v2652_v47 }
 0x3e1   :  { %2665 = vrcp.f32 %v1201_v46  ;;  %v1202_v51 = vadd.f32 1.0, %v2654_v48  ;;  %v2656_v55 = vpop.eup %2655 }
 0x3e2   :  { %2667 = vrcp.f32 %v1199_v50  ;;  %v2658_v43 = vpop.eup %2657  ;;  %v1200_v39 = vadd.f32 1.0, %v2656_v55 }
 0x3e3   :  { %2669 = vrcp.f32 %v1202_v51  ;;  %v2660_v61 = vpop.eup %2659  ;;  %v1203_v5 = vadd.f32 1.0, %v2658_v43 }
 0x3e4   :  { %v2662_v62 = vpop.eup %2661  ;;  %2671 = vrcp.f32 %v1200_v39 }
 0x3e5   :  { %2673 = vrcp.f32 %v1203_v5 }
 0x3ed   :  { %v2664_v0 = vpop.eup %2663 }
 0x3ee   :  { %v2666_v59 = vpop.eup %2665  ;;  %v1226_v8 = vmul.f32 %v2664_v0, %v2660_v61 }
 0x3ef   :  { %v2668_v1 = vpop.eup %2667  ;;  %v1227_v10 = vmul.f32 %v2666_v59, %v2662_v62 }
 0x3f0   :  { %v2670_v6 = vpop.eup %2669  ;;  %v1224_v7 = vmul.f32 %v2668_v1, %v1220_v60 }
 0x3f1   :  { %v1225_v9 = vmul.f32 %v2670_v6, %v1221_v3  ;;  %v2672_v34 = vpop.eup %2671 }
 0x3f2   :  { %v3202_v15 = vadd.f32 %v1226_v8, %v1224_v7  ;;  %v2674_v29 = vpop.eup %2673 }
 0x3f3   :  { %v3204_v28 = vadd.f32 %v1227_v10, %v1225_v9 }
 0x3f4   :  { %2675 = vtanh.f32 %v3202_v15 }
 0x3f5   :  { %2677 = vtanh.f32 %v3204_v28 }
 0x401   :  { %v2676_v30 = vpop.eup %2675 }
 0x402   :  { %v2678_v33 = vpop.eup %2677  ;;  %v1232_v31 = vmul.f32 %v2676_v30, %v2672_v34 }
 0x403   :  { %v1233_v32 = vmul.f32 %v2678_v33, %v2674_v29 }
 0x404   :  { %v1236_v56 = vrot.slane %v1232_v31, 2  ;;  %v2179_v35 = vrot.slane %v1232_v31, 7  ;;  %v1451_v31 = vrot.slane %v3202_v15, 7 }
 0x405   :  { %v1237_v36 = vrot.slane %v1233_v32, 1  ;;  %v2286_v54 = vrot.slane %v1233_v32, 7 }
 0x406   :  { %v3209_v37 = vsel %vm2194_vm5, %v3170_v57, %v2179_v35  ;;  %v1452_v35 = vrot.slane %v3204_v28, 7 }
 0x407   :  { %v1238_v40 = vsel %vm780_vm2, %v1237_v36, %v1236_v56  ;;  %v3213_v42 = vsel %vm2194_vm5, %v3167_v52, %v2286_v54 }
 0x408   :  { %2425 = vmatmul.mubr.msk.f32.vlgmr.msra.gmra.mxu0 %vm382_vm1, %v1238_v40  ;;  %2426 = vmatmul.mubr.msk.f32.vlgmr.msra.gmra.mxu1 %vm382_vm1, %v1238_v40 }
 0x409   :  { %1497 = vmatpush1.msra.mxu0 %v2931_v12  ;;  %1568 = vmatpush1.msra.mxu1 %v2987_v21 }
 0x40a   :  { %1498 = vmatprep.subr.mxu0 %v2937_v13  ;;  %1569 = vmatprep.subr.mxu1 %v2994_v22 }
 0x40b   :  { %1499 = vmatpush1.msra.mxu0 %v2944_v14  ;;  %1570 = vmatpush1.msra.mxu1 %v3001_v23 }
 0x40c   :  { %1500 = vmatprep.subr.mxu0 %v2956_v16  ;;  %1571 = vmatprep.subr.mxu1 %v3008_v24 }
 0x40d   :  { %1501 = vmatpush1.msra.mxu0 %v2962_v17  ;;  %1572 = vmatpush1.msra.mxu1 %v3015_v25 }
 0x40e   :  { %1502 = vmatprep.subr.mxu0 %v2968_v18  ;;  %1573 = vmatprep.subr.mxu1 %v3021_v26 }
 0x40f   :  { %1503 = vmatpush1.msra.mxu0 %v2974_v19  ;;  %1536 = vmatprep.mubr.f32.mxu0 %v2845_v4 }
 0x410   :  { %1574 = vmatpush1.msra.mxu1 %v3029_v27  ;;  %1607 = vmatprep.mubr.f32.mxu1 %v2845_v4 }
 0x411   :  { %1727 = vmatprep.subr.mxu0 %v2926_v11  ;;  %1798 = vmatprep.subr.mxu1 %v2980_v20 }
 0x4c8   :  { %v1307_v12 = vpop.f32.mrf.mxu0  ;;  %v1378_v52 = vpop.f32.mrf.mxu1 }
 0x4c9   :  { %v1387_v13 = vrot.slane %v1307_v12, 5  ;;  %v1391_v14 = vrot.slane %v1307_v12, 6  ;;  %v1389_v46 = vrot.slane %v1378_v52, 5  ;;  %v1393_v47 = vrot.slane %v1378_v52, 6 }
 0x4ca   :  { %v1309_v16 = vpop.f32.mrf.mxu0  ;;  %v1380_v48 = vpop.f32.mrf.mxu1 }
 0x4cb   :  { %v1403_v17 = vadd.f32 %v1387_v13, %v3058_v38  ;;  %v1407_v18 = vadd.f32 %v1391_v14, %v3062_v45  ;;  %v1388_v21 = vrot.slane %v1309_v16, 5  ;;  %v1392_v19 = vrot.slane %v1309_v16, 6 }
 0x4cc   :  { %v1405_v50 = vadd.f32 %v1389_v46, %v3066_v53  ;;  %v1409_v51 = vadd.f32 %v1393_v47, %v3070_v63  ;;  %v1390_v55 = vrot.slane %v1380_v48, 5  ;;  %v1394_v43 = vrot.slane %v1380_v48, 6  ;;  %v3263_v47 = vld [vmem:[%s3511_s3 + $0x60] sm:$0xff]  ;;  %v3281_v48 = vld [vmem:[%s3511_s3 + $0x58] sm:$0xff] }
 0x4cd   :  { %v2427_v22 = vmul.f32 -1.442695, %v1403_v17  ;;  %v2430_v23 = vmul.f32 -1.442695, %v1407_v18  ;;  %v1404_v57 = vadd.f32 %v1388_v21, %v3060_v41  ;;  %v1408_v44 = vadd.f32 %v1392_v19, %v3064_v49 }
 0x4ce   :  { %v2429_v61 = vmul.f32 -1.442695, %v1405_v50  ;;  %v2432_v62 = vmul.f32 -1.442695, %v1409_v51  ;;  %v1406_v0 = vadd.f32 %v1390_v55, %v3068_v58  ;;  %v1410_v60 = vadd.f32 %v1394_v43, %v3072_v2  ;;  %v3287_v50 = vld [vmem:[%s3511_s3 + $0x40] sm:$0xff]  ;;  %v3293_v51 = vld [vmem:[%s3511_s3 + $0x50] sm:$0xff] }
 0x4cf   :  { %2679 = vpow2.f32 %v2427_v22  ;;  %v2428_v11 = vmul.f32 -1.442695, %v1404_v57  ;;  %v2431_v20 = vmul.f32 -1.442695, %v1408_v44  ;;  %v3299_v55 = vld [vmem:[%s3511_s3 + $0x28] sm:$0xff]  ;;  %v3306_v43 = vld [vmem:[%s3511_s3 + $0x20] sm:$0xff] }
 0x4d0   :  { %2681 = vpow2.f32 %v2430_v23 }
 0x4d1   :  { %2683 = vpow2.f32 %v2428_v11 }
 0x4d2   :  { %2685 = vpow2.f32 %v2431_v20 }
 0x4d3   :  { %2687 = vpow2.f32 %v2429_v61  ;;  %v3313_v61 = vld [vmem:[%s3511_s3 + $0x8] sm:$0xff] }
 0x4d4   :  { %2689 = vpow2.f32 %v2432_v62 }
 0x4d5   :  { %2691 = vtanh.f32 %v1406_v0 }
 0x4d6   :  { %2693 = vtanh.f32 %v1410_v60 }
 0x4dc   :  { %v2680_v59 = vpop.eup %2679 }
 0x4dd   :  { %v2682_v39 = vpop.eup %2681  ;;  %v1429_v1 = vadd.f32 1.0, %v2680_v59 }
 0x4de   :  { %v1432_v3 = vadd.f32 1.0, %v2682_v39  ;;  %v2684_v5 = vpop.eup %2683 }
 0x4df   :  { %v2686_v6 = vpop.eup %2685  ;;  %2695 = vrcp.f32 %v1429_v1  ;;  %v1430_v7 = vadd.f32 1.0, %v2684_v5 }
 0x4e0   :  { %2697 = vrcp.f32 %v1432_v3  ;;  %v1433_v8 = vadd.f32 1.0, %v2686_v6  ;;  %v2688_v9 = vpop.eup %2687 }
 0x4e1   :  { %2699 = vrcp.f32 %v1430_v7  ;;  %v2690_v10 = vpop.eup %2689  ;;  %v1431_v32 = vadd.f32 1.0, %v2688_v9 }
 0x4e2   :  { %2701 = vrcp.f32 %v1433_v8  ;;  %v2692_v34 = vpop.eup %2691  ;;  %v1434_v36 = vadd.f32 1.0, %v2690_v10 }
 0x4e3   :  { %v2694_v29 = vpop.eup %2693  ;;  %2703 = vrcp.f32 %v1431_v32 }
 0x4e4   :  { %2705 = vrcp.f32 %v1434_v36 }
 0x4ec   :  { %v2696_v30 = vpop.eup %2695 }
 0x4ed   :  { %v2698_v33 = vpop.eup %2697  ;;  %v1457_v12 = vmul.f32 %v2696_v30, %v2692_v34 }
 0x4ee   :  { %v2700_v56 = vpop.eup %2699  ;;  %v1458_v14 = vmul.f32 %v2698_v33, %v2694_v29 }
 0x4ef   :  { %v2702_v54 = vpop.eup %2701  ;;  %v1455_v40 = vmul.f32 %v2700_v56, %v1451_v31 }
 0x4f0   :  { %v1456_v13 = vmul.f32 %v2702_v54, %v1452_v35  ;;  %v2704_v15 = vpop.eup %2703 }
 0x4f1   :  { %v3245_v16 = vadd.f32 %v1457_v12, %v1455_v40  ;;  %v2706_v18 = vpop.eup %2705 }
 0x4f2   :  { %v3247_v17 = vadd.f32 %v1458_v14, %v1456_v13 }
 0x4f3   :  { %2707 = vtanh.f32 %v3245_v16 }
 0x4f4   :  { %2709 = vtanh.f32 %v3247_v17 }
 0x500   :  { %v2708_v21 = vpop.eup %2707 }
 0x501   :  { %v2710_v28 = vpop.eup %2709  ;;  %v1463_v19 = vmul.f32 %v2708_v21, %v2704_v15 }
 0x502   :  { %v1464_v22 = vmul.f32 %v2710_v28, %v2706_v18 }
 0x503   :  { %v1467_v23 = vrot.slane %v1463_v19, 3  ;;  %v2181_v52 = vrot.slane %v1463_v19, 7 }
 0x504   :  { %v1468_v57 = vrot.slane %v1464_v22, 2  ;;  %v2288_v44 = vrot.slane %v1464_v22, 7 }
 0x505   :  { %v3252_v11 = vsel %vm2196_vm6, %v3209_v37, %v2181_v52  ;;  %v3269_v37 = vld [vmem:[%s3511_s3 + $0x70] sm:$0xff] }
 0x506   :  { %v1469_v20 = vsel %vm780_vm2, %v1468_v57, %v1467_v23  ;;  %v3256_v46 = vsel %vm2196_vm6, %v3213_v42, %v2288_v44  ;;  %v3275_v42 = vld [vmem:[%s3511_s3 + $0x48] sm:$0xff] }
 0x507   :  { %2433 = vmatmul.mubr.msk.f32.vlgmr.msra.gmra.mxu0 %vm382_vm1, %v1469_v20  ;;  %2434 = vmatmul.mubr.msk.f32.vlgmr.msra.gmra.mxu1 %vm382_vm1, %v1469_v20 }
 0x508   :  { %1728 = vmatpush1.msra.mxu0 %v3263_v47  ;;  %1799 = vmatpush1.msra.mxu1 %v3269_v37 }
 0x509   :  { %1729 = vmatprep.subr.mxu0 %v3275_v42  ;;  %1800 = vmatprep.subr.mxu1 %v3281_v48 }
 0x50a   :  { %1730 = vmatpush1.msra.mxu0 %v3287_v50  ;;  %1801 = vmatpush1.msra.mxu1 %v3293_v51 }
 0x50b   :  { %1731 = vmatprep.subr.mxu0 %v3299_v55  ;;  %1802 = vmatprep.subr.mxu1 %v3008_v24  ;;  %v3320_v24 = vld [vmem:[%s3511_s3] sm:$0xff] }
 0x50c   :  { %1732 = vmatpush1.msra.mxu0 %v3306_v43  ;;  %1803 = vmatpush1.msra.mxu1 %v3015_v25  ;;  %v2817_v25 = vld [vmem:[%s3511_s3 + $0x68] sm:$0xff] }
 0x50d   :  { %1733 = vmatprep.subr.mxu0 %v3313_v61  ;;  %1804 = vmatprep.subr.mxu1 %v3021_v26  ;;  %v2818_v26 = vld [vmem:[%s3511_s3 + $0x78] sm:$0xff] }
 0x50e   :  { %1734 = vmatpush1.msra.mxu0 %v3320_v24  ;;  %1767 = vmatprep.mubr.f32.mxu0 %v2845_v4 }
 0x50f   :  { %1805 = vmatpush1.msra.mxu1 %v3029_v27  ;;  %1838 = vmatprep.mubr.f32.mxu1 %v2845_v4 }
 0x510   :  { %1958 = vmatprep.subr.mxu0 %v2817_v25  ;;  %2029 = vmatprep.subr.mxu1 %v2818_v26  ;;  %v1682_v26 = vrot.slane %v3245_v16, 7 }
 0x5c7   :  { %v1538_v62 = vpop.f32.mrf.mxu0  ;;  %v1609_v7 = vpop.f32.mrf.mxu1 }
 0x5c8   :  { %v1618_v0 = vrot.slane %v1538_v62, 4  ;;  %v1622_v59 = vrot.slane %v1538_v62, 5  ;;  %v1620_v29 = vrot.slane %v1609_v7, 4  ;;  %v1624_v30 = vrot.slane %v1609_v7, 5 }
 0x5c9   :  { %v1540_v60 = vpop.f32.mrf.mxu0  ;;  %v1611_v33 = vpop.f32.mrf.mxu1 }
 0x5ca   :  { %v1634_v39 = vadd.f32 %v1618_v0, %v3058_v38  ;;  %v1638_v27 = vadd.f32 %v1622_v59, %v3062_v45  ;;  %v1619_v1 = vrot.slane %v1540_v60, 4  ;;  %v1623_v3 = vrot.slane %v1540_v60, 5 }
 0x5cb   :  { %v1636_v31 = vadd.f32 %v1620_v29, %v3066_v53  ;;  %v1640_v32 = vadd.f32 %v1624_v30, %v3070_v63  ;;  %v1621_v56 = vrot.slane %v1611_v33, 4  ;;  %v1625_v35 = vrot.slane %v1611_v33, 5 }
 0x5cc   :  { %v2435_v5 = vmul.f32 -1.442695, %v1634_v39  ;;  %v2438_v6 = vmul.f32 -1.442695, %v1638_v27  ;;  %v1635_v8 = vadd.f32 %v1619_v1, %v3060_v41  ;;  %v1639_v9 = vadd.f32 %v1623_v3, %v3064_v49 }
 0x5cd   :  { %v2437_v36 = vmul.f32 -1.442695, %v1636_v31  ;;  %v2440_v54 = vmul.f32 -1.442695, %v1640_v32  ;;  %v1637_v40 = vadd.f32 %v1621_v56, %v3068_v58  ;;  %v1641_v13 = vadd.f32 %v1625_v35, %v3072_v2 }
 0x5ce   :  { %2711 = vpow2.f32 %v2435_v5  ;;  %v2436_v10 = vmul.f32 -1.442695, %v1635_v8  ;;  %v2439_v34 = vmul.f32 -1.442695, %v1639_v9  ;;  %v1683_v59 = vrot.slane %v3247_v17, 7 }
 0x5cf   :  { %2713 = vpow2.f32 %v2438_v6 }
 0x5d0   :  { %2715 = vpow2.f32 %v2436_v10 }
 0x5d1   :  { %2717 = vpow2.f32 %v2439_v34 }
 0x5d2   :  { %2719 = vpow2.f32 %v2437_v36 }
 0x5d3   :  { %2721 = vpow2.f32 %v2440_v54 }
 0x5d4   :  { %2723 = vtanh.f32 %v1637_v40 }
 0x5d5   :  { %2725 = vtanh.f32 %v1641_v13 }
 0x5db   :  { %v2712_v12 = vpop.eup %2711 }
 0x5dc   :  { %v2714_v14 = vpop.eup %2713  ;;  %v1660_v15 = vadd.f32 1.0, %v2712_v12 }
 0x5dd   :  { %v1663_v18 = vadd.f32 1.0, %v2714_v14  ;;  %v2716_v21 = vpop.eup %2715 }
 0x5de   :  { %v2718_v28 = vpop.eup %2717  ;;  %2727 = vrcp.f32 %v1660_v15  ;;  %v1661_v19 = vadd.f32 1.0, %v2716_v21 }
 0x5df   :  { %2729 = vrcp.f32 %v1663_v18  ;;  %v1664_v22 = vadd.f32 1.0, %v2718_v28  ;;  %v2720_v23 = vpop.eup %2719 }
 0x5e0   :  { %2731 = vrcp.f32 %v1661_v19  ;;  %v2722_v52 = vpop.eup %2721  ;;  %v1662_v62 = vadd.f32 1.0, %v2720_v23 }
 0x5e1   :  { %2733 = vrcp.f32 %v1664_v22  ;;  %v2724_v57 = vpop.eup %2723  ;;  %v1665_v60 = vadd.f32 1.0, %v2722_v52 }
 0x5e2   :  { %v2726_v44 = vpop.eup %2725  ;;  %2735 = vrcp.f32 %v1662_v62 }
 0x5e3   :  { %2737 = vrcp.f32 %v1665_v60 }
 0x5eb   :  { %v2728_v20 = vpop.eup %2727 }
 0x5ec   :  { %v2730_v25 = vpop.eup %2729  ;;  %v1688_v1 = vmul.f32 %v2728_v20, %v2724_v57 }
 0x5ed   :  { %v2732_v0 = vpop.eup %2731  ;;  %v1689_v5 = vmul.f32 %v2730_v25, %v2726_v44 }
 0x5ee   :  { %v2734_v39 = vpop.eup %2733  ;;  %v1686_v27 = vmul.f32 %v2732_v0, %v1682_v26 }
 0x5ef   :  { %v1687_v3 = vmul.f32 %v2734_v39, %v1683_v59  ;;  %v2736_v16 = vpop.eup %2735 }
 0x5f0   :  { %v3342_v6 = vadd.f32 %v1688_v1, %v1686_v27  ;;  %v2738_v8 = vpop.eup %2737 }
 0x5f1   :  { %v3344_v7 = vadd.f32 %v1689_v5, %v1687_v3 }
 0x5f2   :  { %2739 = vtanh.f32 %v3342_v6 }
 0x5f3   :  { %2741 = vtanh.f32 %v3344_v7 }
 0x5ff   :  { %v2740_v9 = vpop.eup %2739 }
 0x600   :  { %v2742_v17 = vpop.eup %2741  ;;  %v1694_v10 = vmul.f32 %v2740_v9, %v2736_v16 }
 0x601   :  { %v1695_v34 = vmul.f32 %v2742_v17, %v2738_v8 }
 0x602   :  { %v1698_v29 = vrot.slane %v1694_v10, 4  ;;  %v2183_v30 = vrot.slane %v1694_v10, 7  ;;  %v1913_v10 = vrot.slane %v3342_v6, 7 }
 0x603   :  { %v1699_v33 = vrot.slane %v1695_v34, 3  ;;  %v2290_v31 = vrot.slane %v1695_v34, 7 }
 0x604   :  { %v3349_v32 = vsel %vm2198_vm7, %v3252_v11, %v2183_v30  ;;  %v2819_v11 = vld [vmem:[%s3511_s3 + $0x38] sm:$0xff]  ;;  %v1914_v30 = vrot.slane %v3344_v7, 7 }
 0x605   :  { %v1700_v56 = vsel %vm780_vm2, %v1699_v33, %v1698_v29  ;;  %v3353_v35 = vsel %vm2198_vm7, %v3256_v46, %v2290_v31  ;;  %v2820_v46 = vld [vmem:[%s3511_s3 + $0x30] sm:$0xff] }
 0x606   :  { %2441 = vmatmul.mubr.msk.f32.vlgmr.msra.gmra.mxu0 %vm382_vm1, %v1700_v56  ;;  %2442 = vmatmul.mubr.msk.f32.vlgmr.msra.gmra.mxu1 %vm382_vm1, %v1700_v56 }
 0x607   :  { %1959 = vmatpush1.msra.mxu0 %v3263_v47  ;;  %2030 = vmatpush1.msra.mxu1 %v3269_v37  ;;  %v2821_v47 = vld [vmem:[%s3511_s3 + $0x18] sm:$0xff]  ;;  %v2822_v37 = vld [vmem:[%s3511_s3 + $0x10] sm:$0xff] }
 0x608   :  { %1960 = vmatprep.subr.mxu0 %v3275_v42  ;;  %2031 = vmatprep.subr.mxu1 %v3281_v48 }
 0x609   :  { %1961 = vmatpush1.msra.mxu0 %v3287_v50  ;;  %2032 = vmatpush1.msra.mxu1 %v3293_v51 }
 0x60a   :  { %1962 = vmatprep.subr.mxu0 %v3299_v55  ;;  %2033 = vmatprep.subr.mxu1 %v2819_v11 }
 0x60b   :  { %1963 = vmatpush1.msra.mxu0 %v3306_v43  ;;  %2034 = vmatpush1.msra.mxu1 %v2820_v46 }
 0x60c   :  { %1964 = vmatprep.subr.mxu0 %v3313_v61  ;;  %2035 = vmatprep.subr.mxu1 %v2821_v47 }
 0x60d   :  { %1965 = vmatpush1.msra.mxu0 %v3320_v24  ;;  %1998 = vmatprep.mubr.f32.mxu0 %v2845_v4 }
 0x60e   :  { %2036 = vmatpush1.msra.mxu1 %v2822_v37  ;;  %2069 = vmatprep.mubr.f32.mxu1 %v2845_v4 }
 0x60f   :  { %2492 = vmatprep.subr.mxu0 %v2845_v4  ;;  %2527 = vmatprep.subr.mxu1 %v2845_v4 }
 0x6c6   :  { %v1769_v42 = vpop.f32.mrf.mxu0  ;;  %v1840_v40 = vpop.f32.mrf.mxu1 }
 0x6c7   :  { %v1849_v48 = vrot.slane %v1769_v42, 3  ;;  %v1853_v50 = vrot.slane %v1769_v42, 4  ;;  %v1851_v18 = vrot.slane %v1840_v40, 3  ;;  %v1855_v21 = vrot.slane %v1840_v40, 4 }
 0x6c8   :  { %v1771_v51 = vpop.f32.mrf.mxu0  ;;  %v1842_v28 = vpop.f32.mrf.mxu1 }
 0x6c9   :  { %v1865_v55 = vadd.f32 %v1849_v48, %v3058_v38  ;;  %v1869_v43 = vadd.f32 %v1853_v50, %v3062_v45  ;;  %v1850_v61 = vrot.slane %v1771_v51, 3  ;;  %v1854_v24 = vrot.slane %v1771_v51, 4 }
 0x6ca   :  { %v1867_v19 = vadd.f32 %v1851_v18, %v3066_v53  ;;  %v1871_v22 = vadd.f32 %v1855_v21, %v3070_v63  ;;  %v1852_v23 = vrot.slane %v1842_v28, 3  ;;  %v1856_v52 = vrot.slane %v1842_v28, 4  ;;  %v2168_v18 = vld [vmem:[%s3513_s5 + $0x50] sm:$0xff]  ;;  %v2167_v21 = vld [vmem:[%s3513_s5 + $0x48] sm:$0xff]  ;;  %v2166_v28 = vld [vmem:[%s3513_s5 + $0x40] sm:$0xff] }
 0x6cb   :  { %v2443_v36 = vmul.f32 -1.442695, %v1865_v55  ;;  %v2446_v54 = vmul.f32 -1.442695, %v1869_v43  ;;  %v1866_v12 = vadd.f32 %v1850_v61, %v3060_v41  ;;  %v1870_v13 = vadd.f32 %v1854_v24, %v3064_v49 }
 0x6cc   :  { %v2445_v57 = vmul.f32 -1.442695, %v1867_v19  ;;  %v2448_v44 = vmul.f32 -1.442695, %v1871_v22  ;;  %v1868_v20 = vadd.f32 %v1852_v23, %v3068_v58  ;;  %v1872_v26 = vadd.f32 %v1856_v52, %v3072_v2  ;;  %v2165_v19 = vld [vmem:[%s3513_s5 + $0x38] sm:$0xff]  ;;  %v2164_v22 = vld [vmem:[%s3513_s5 + $0x30] sm:$0xff] }
 0x6cd   :  { %2743 = vpow2.f32 %v2443_v36  ;;  %v2444_v14 = vmul.f32 -1.442695, %v1866_v12  ;;  %v2447_v15 = vmul.f32 -1.442695, %v1870_v13  ;;  %v2173_v13 = vld [vmem:[%s3513_s5 + $0x78] sm:$0xff]  ;;  %v2163_v23 = vld [vmem:[%s3513_s5 + $0x28] sm:$0xff] }
 0x6ce   :  { %2745 = vpow2.f32 %v2446_v54  ;;  %v2162_v52 = vld [vmem:[%s3513_s5 + $0x20] sm:$0xff] }
 0x6cf   :  { %2747 = vpow2.f32 %v2444_v14  ;;  %v2170_v14 = vld [vmem:[%s3513_s5 + $0x60] sm:$0xff] }
 0x6d0   :  { %2749 = vpow2.f32 %v2447_v15  ;;  %v2169_v15 = vld [vmem:[%s3513_s5 + $0x58] sm:$0xff] }
 0x6d1   :  { %2751 = vpow2.f32 %v2445_v57  ;;  %v2161_v57 = vld [vmem:[%s3513_s5 + $0x18] sm:$0xff] }
 0x6d2   :  { %2753 = vpow2.f32 %v2448_v44  ;;  %v2160_v44 = vld [vmem:[%s3513_s5 + $0x10] sm:$0xff] }
 0x6d3   :  { %2755 = vtanh.f32 %v1868_v20  ;;  %v2159_v20 = vld [vmem:[%s3513_s5 + $0x8] sm:$0xff] }
 0x6d4   :  { %2757 = vtanh.f32 %v1872_v26 }
 0x6da   :  { %v2744_v25 = vpop.eup %2743 }
 0x6db   :  { %v2746_v62 = vpop.eup %2745  ;;  %v1891_v0 = vadd.f32 1.0, %v2744_v25  ;;  %v2158_v25 = vld [vmem:[%s3513_s5] sm:$0xff] }
 0x6dc   :  { %v1894_v59 = vadd.f32 1.0, %v2746_v62  ;;  %v2748_v60 = vpop.eup %2747 }
 0x6dd   :  { %v2750_v39 = vpop.eup %2749  ;;  %2759 = vrcp.f32 %v1891_v0  ;;  %v1892_v27 = vadd.f32 1.0, %v2748_v60 }
 0x6de   :  { %2761 = vrcp.f32 %v1894_v59  ;;  %v1895_v1 = vadd.f32 1.0, %v2750_v39  ;;  %v2752_v3 = vpop.eup %2751 }
 0x6df   :  { %2763 = vrcp.f32 %v1892_v27  ;;  %v2754_v5 = vpop.eup %2753  ;;  %v1893_v34 = vadd.f32 1.0, %v2752_v3 }
 0x6e0   :  { %2765 = vrcp.f32 %v1895_v1  ;;  %v2756_v16 = vpop.eup %2755  ;;  %v1896_v33 = vadd.f32 1.0, %v2754_v5 }
 0x6e1   :  { %v2758_v8 = vpop.eup %2757  ;;  %2767 = vrcp.f32 %v1893_v34 }
 0x6e2   :  { %2769 = vrcp.f32 %v1896_v33 }
 0x6ea   :  { %v2760_v9 = vpop.eup %2759 }
 0x6eb   :  { %v2762_v17 = vpop.eup %2761  ;;  %v1919_v11 = vmul.f32 %v2760_v9, %v2756_v16 }
 0x6ec   :  { %v2764_v29 = vpop.eup %2763  ;;  %v1920_v47 = vmul.f32 %v2762_v17, %v2758_v8 }
 0x6ed   :  { %v2766_v31 = vpop.eup %2765  ;;  %v1917_v56 = vmul.f32 %v2764_v29, %v1913_v10 }
 0x6ee   :  { %v1918_v46 = vmul.f32 %v2766_v31, %v1914_v30  ;;  %v2768_v6 = vpop.eup %2767 }
 0x6ef   :  { %v3393_v37 = vadd.f32 %v1919_v11, %v1917_v56  ;;  %v2770_v48 = vpop.eup %2769 }
 0x6f0   :  { %v3395_v42 = vadd.f32 %v1920_v47, %v1918_v46 }
 0x6f1   :  { %2771 = vtanh.f32 %v3393_v37 }
 0x6f2   :  { %2773 = vtanh.f32 %v3395_v42 }
 0x6fe   :  { %v2772_v50 = vpop.eup %2771 }
 0x6ff   :  { %v2774_v7 = vpop.eup %2773  ;;  %v1925_v51 = vmul.f32 %v2772_v50, %v2768_v6 }
 0x700   :  { %v1926_v55 = vmul.f32 %v2774_v7, %v2770_v48 }
 0x701   :  { %v1929_v43 = vrot.slane %v1925_v51, 5  ;;  %v2185_v61 = vrot.slane %v1925_v51, 7 }
 0x702   :  { %v1930_v24 = vrot.slane %v1926_v55, 4  ;;  %v2292_v36 = vrot.slane %v1926_v55, 7 }
 0x703   :  { %v3400_v54 = vsel %vm2200_vm8, %v3349_v32, %v2185_v61  ;;  %v2172_v32 = vld [vmem:[%s3513_s5 + $0x70] sm:$0xff]  ;;  %v2144_v61 = vrot.slane %v3393_v37, 7 }
 0x704   :  { %v1931_v40 = vsel %vm780_vm2, %v1930_v24, %v1929_v43  ;;  %v3404_v12 = vsel %vm2200_vm8, %v3353_v35, %v2292_v36  ;;  %v2171_v35 = vld [vmem:[%s3513_s5 + $0x68] sm:$0xff] }
 0x705   :  { %2449 = vmatmul.mubr.msk.f32.vlgmr.msra.gmra.mxu0 %vm382_vm1, %v1931_v40  ;;  %2450 = vmatmul.mubr.msk.f32.vlgmr.msra.gmra.mxu1 %vm382_vm1, %v1931_v40  ;;  %v2145_v40 = vrot.slane %v3395_v42, 7 }
 0x706   :  { %2493 = vmatpush3.msra.mxu0 %v2173_v13  ;;  %2528 = vmatpush3.msra.mxu1 %v2173_v13 }
 0x707   :  { %2494 = vmatprep.subr.mxu0 %v2845_v4  ;;  %2529 = vmatprep.subr.mxu1 %v2845_v4 }
 0x708   :  { %2495 = vmatpush3.msra.mxu0 %v2172_v32  ;;  %2530 = vmatpush3.msra.mxu1 %v2172_v32 }
 0x709   :  { %2496 = vmatprep.subr.mxu0 %v2845_v4  ;;  %2531 = vmatprep.subr.mxu1 %v2845_v4 }
 0x70a   :  { %2497 = vmatpush3.msra.mxu0 %v2171_v35  ;;  %2532 = vmatpush3.msra.mxu1 %v2171_v35 }
 0x70b   :  { %2498 = vmatprep.subr.mxu0 %v2845_v4  ;;  %2533 = vmatprep.subr.mxu1 %v2845_v4 }
 0x70c   :  { %2499 = vmatpush3.msra.mxu0 %v2170_v14  ;;  %2534 = vmatpush3.msra.mxu1 %v2170_v14 }
 0x70d   :  { %2500 = vmatprep.subr.mxu0 %v2845_v4  ;;  %2535 = vmatprep.subr.mxu1 %v2845_v4 }
 0x70e   :  { %2501 = vmatpush3.msra.mxu0 %v2169_v15  ;;  %2536 = vmatpush3.msra.mxu1 %v2169_v15 }
 0x70f   :  { %2502 = vmatprep.subr.mxu0 %v2845_v4  ;;  %2537 = vmatprep.subr.mxu1 %v2845_v4 }
 0x710   :  { %2503 = vmatpush3.msra.mxu0 %v2168_v18  ;;  %2538 = vmatpush3.msra.mxu1 %v2168_v18 }
 0x711   :  { %2504 = vmatprep.subr.mxu0 %v2845_v4  ;;  %2539 = vmatprep.subr.mxu1 %v2845_v4 }
 0x712   :  { %2505 = vmatpush3.msra.mxu0 %v2167_v21  ;;  %2540 = vmatpush3.msra.mxu1 %v2167_v21 }
 0x713   :  { %2506 = vmatprep.subr.mxu0 %v2845_v4  ;;  %2541 = vmatprep.subr.mxu1 %v2845_v4 }
 0x714   :  { %2507 = vmatpush3.msra.mxu0 %v2166_v28  ;;  %2542 = vmatpush3.msra.mxu1 %v2166_v28 }
 0x715   :  { %2508 = vmatprep.subr.mxu0 %v2845_v4  ;;  %2543 = vmatprep.subr.mxu1 %v2845_v4 }
 0x716   :  { %2509 = vmatpush3.msra.mxu0 %v2165_v19  ;;  %2544 = vmatpush3.msra.mxu1 %v2165_v19 }
 0x717   :  { %2510 = vmatprep.subr.mxu0 %v2845_v4  ;;  %2545 = vmatprep.subr.mxu1 %v2845_v4 }
 0x718   :  { %2511 = vmatpush3.msra.mxu0 %v2164_v22  ;;  %2546 = vmatpush3.msra.mxu1 %v2164_v22 }
 0x719   :  { %2512 = vmatprep.subr.mxu0 %v2845_v4  ;;  %2547 = vmatprep.subr.mxu1 %v2845_v4 }
 0x71a   :  { %2513 = vmatpush3.msra.mxu0 %v2163_v23  ;;  %2548 = vmatpush3.msra.mxu1 %v2163_v23 }
 0x71b   :  { %2514 = vmatprep.subr.mxu0 %v2845_v4  ;;  %2549 = vmatprep.subr.mxu1 %v2845_v4 }
 0x71c   :  { %2515 = vmatpush3.msra.mxu0 %v2162_v52  ;;  %2550 = vmatpush3.msra.mxu1 %v2162_v52 }
 0x71d   :  { %2516 = vmatprep.subr.mxu0 %v2845_v4  ;;  %2551 = vmatprep.subr.mxu1 %v2845_v4 }
 0x71e   :  { %2517 = vmatpush3.msra.mxu0 %v2161_v57  ;;  %2552 = vmatpush3.msra.mxu1 %v2161_v57 }
 0x71f   :  { %2518 = vmatprep.subr.mxu0 %v2845_v4  ;;  %2553 = vmatprep.subr.mxu1 %v2845_v4 }
 0x720   :  { %2519 = vmatpush3.msra.mxu0 %v2160_v44  ;;  %2554 = vmatpush3.msra.mxu1 %v2160_v44 }
 0x721   :  { %2520 = vmatprep.subr.mxu0 %v2845_v4  ;;  %2555 = vmatprep.subr.mxu1 %v2845_v4 }
 0x722   :  { %2521 = vmatpush3.msra.mxu0 %v2159_v20  ;;  %2556 = vmatpush3.msra.mxu1 %v2159_v20 }
 0x723   :  { %2522 = vmatprep.subr.mxu0 %v2845_v4  ;;  %2557 = vmatprep.subr.mxu1 %v2845_v4 }
 0x724   :  { %2523 = vmatpush3.msra.mxu0 %v2158_v25  ;;  %2524 = vmatprep.mubr.msk.f32.mxu0 %vm2846_vm9, %v2845_v4 }
 0x725   :  { %2558 = vmatpush3.msra.mxu1 %v2158_v25  ;;  %2559 = vmatprep.mubr.msk.f32.mxu1 %vm2846_vm9, %v2845_v4 }
 0x7c5   :  { %v2000_v26 = vpop.f32.mrf.mxu0  ;;  %v2071_v16 = vpop.f32.mrf.mxu1 }
 0x7c6   :  { %v2080_v62 = vrot.slane %v2000_v26, 2  ;;  %v2084_v0 = vrot.slane %v2000_v26, 3  ;;  %v2082_v10 = vrot.slane %v2071_v16, 2  ;;  %v2086_v34 = vrot.slane %v2071_v16, 3  ;;  %v2457_v26 = vld [vmem:[%s3514_s6] ss:$0 sm:$0xff] }
 0x7c7   :  { %v2002_v59 = vpop.f32.mrf.mxu0 }
 0x7c8   :  { %v2096_v60 = vadd.f32 %v2080_v62, %v3058_v38  ;;  %v2100_v39 = vadd.f32 %v2084_v0, %v3062_v45  ;;  %v2081_v27 = vrot.slane %v2002_v59, 2  ;;  %v2085_v1 = vrot.slane %v2002_v59, 3  ;;  %v2073_v38 = vpop.f32.mrf.mxu1 }
 0x7c9   :  { %v2098_v45 = vadd.f32 %v2082_v10, %v3066_v53  ;;  %v2102_v29 = vadd.f32 %v2086_v34, %v3070_v63  ;;  %v2083_v30 = vrot.slane %v2073_v38, 2  ;;  %v2087_v33 = vrot.slane %v2073_v38, 3 }
 0x7ca   :  { %v2451_v3 = vmul.f32 -1.442695, %v2096_v60  ;;  %v2454_v5 = vmul.f32 -1.442695, %v2100_v39  ;;  %v2097_v8 = vadd.f32 %v2081_v27, %v3060_v41  ;;  %v2101_v9 = vadd.f32 %v2085_v1, %v3064_v49 }
 0x7cb   :  { %v2453_v31 = vmul.f32 -1.442695, %v2098_v45  ;;  %v2456_v56 = vmul.f32 -1.442695, %v2102_v29  ;;  %v2099_v41 = vadd.f32 %v2083_v30, %v3068_v58  ;;  %v2103_v11 = vadd.f32 %v2087_v33, %v3072_v2 }
 0x7cc   :  { %2775 = vpow2.f32 %v2451_v3  ;;  %v2452_v4 = vmul.f32 -1.442695, %v2097_v8  ;;  %v2455_v17 = vmul.f32 -1.442695, %v2101_v9 }
 0x7cd   :  { %2777 = vpow2.f32 %v2454_v5 }
 0x7ce   :  { %2779 = vpow2.f32 %v2452_v4 }
 0x7cf   :  { %2781 = vpow2.f32 %v2455_v17 }
 0x7d0   :  { %2783 = vpow2.f32 %v2453_v31 }
 0x7d1   :  { %2785 = vpow2.f32 %v2456_v56 }
 0x7d2   :  { %2787 = vtanh.f32 %v2099_v41 }
 0x7d3   :  { %2789 = vtanh.f32 %v2103_v11 }
 0x7d9   :  { %v2776_v49 = vpop.eup %2775 }
 0x7da   :  { %v2778_v46 = vpop.eup %2777  ;;  %v2122_v47 = vadd.f32 1.0, %v2776_v49 }
 0x7db   :  { %v2125_v6 = vadd.f32 1.0, %v2778_v46  ;;  %v2780_v48 = vpop.eup %2779 }
 0x7dc   :  { %v2782_v53 = vpop.eup %2781  ;;  %2791 = vrcp.f32 %v2122_v47  ;;  %v2123_v63 = vadd.f32 1.0, %v2780_v48 }
 0x7dd   :  { %2793 = vrcp.f32 %v2125_v6  ;;  %v2126_v50 = vadd.f32 1.0, %v2782_v53  ;;  %v2784_v7 = vpop.eup %2783 }
 0x7de   :  { %2795 = vrcp.f32 %v2123_v63  ;;  %v2786_v58 = vpop.eup %2785  ;;  %v2124_v24 = vadd.f32 1.0, %v2784_v7 }
 0x7df   :  { %2797 = vrcp.f32 %v2126_v50  ;;  %v2788_v51 = vpop.eup %2787  ;;  %v2127_v13 = vadd.f32 1.0, %v2786_v58 }
 0x7e0   :  { %v2790_v55 = vpop.eup %2789  ;;  %2799 = vrcp.f32 %v2124_v24 }
 0x7e1   :  { %2801 = vrcp.f32 %v2127_v13 }
 0x7e9   :  { %v2792_v2 = vpop.eup %2791 }
 0x7ea   :  { %v2794_v43 = vpop.eup %2793  ;;  %v2150_v14 = vmul.f32 %v2792_v2, %v2788_v51 }
 0x7eb   :  { %v2796_v36 = vpop.eup %2795  ;;  %v2151_v18 = vmul.f32 %v2794_v43, %v2790_v55 }
 0x7ec   :  { %v2798_v32 = vpop.eup %2797  ;;  %v2148_v35 = vmul.f32 %v2796_v36, %v2144_v61 }
 0x7ed   :  { %v2149_v15 = vmul.f32 %v2798_v32, %v2145_v40  ;;  %v2800_v19 = vpop.eup %2799 }
 0x7ee   :  { %v2152_v21 = vadd.f32 %v2150_v14, %v2148_v35  ;;  %v2802_v22 = vpop.eup %2801 }
 0x7ef   :  { %v2153_v28 = vadd.f32 %v2151_v18, %v2149_v15 }
 0x7f0   :  { %2803 = vtanh.f32 %v2152_v21 }
 0x7f1   :  { %2805 = vtanh.f32 %v2153_v28 }
 0x7fd   :  { %v2804_v23 = vpop.eup %2803 }
 0x7fe   :  { %v2806_v37 = vpop.eup %2805  ;;  %v2156_v52 = vmul.f32 %v2804_v23, %v2800_v19 }
 0x7ff   :  { %v2157_v57 = vmul.f32 %v2806_v37, %v2802_v22 }
 0x800   :  { %v2188_v42 = vrot.slane %v2156_v52, 7 }
 0x801   :  { %v2295_v44 = vrot.slane %v2157_v57, 7 }
 0x802   :  { %v2203_v20 = vsel %vm2202_vm10, %v3400_v54, %v2188_v42 }
 0x803   :  { %2525 = vmatmul.mubr.f32.vlgmr.msra.gmra.mxu0 %v2203_v20  ;;  %v2303_v25 = vsel %vm2202_vm10, %v3404_v12, %v2295_v44 }
 0x804   :  { %2560 = vmatmul.mubr.f32.vlgmr.msra.gmra.mxu1 %v2303_v25 }
 0x8c3   :  { %v2276_v62 = vpop.f32.mrf.mxu0 }
 0x8c4   :  { %v2277_v0 = vadd.f32 %v2457_v26, %v2276_v62  ;;  %v2370_v59 = vpop.f32.mrf.mxu1 }
 0x8c5   :  { %v2371_v60 = vadd.f32 %v2457_v26, %v2370_v59  ;;  %v2526_v39 = vpop.f32.mrf.mxu0 }
 0x8c6   :  { %2280 = vst.msk [vmem:[#allocation2] sm:$0xff] %vm74_vm0, %v2277_v0  ;;  %v2561_v27 = vpop.f32.mrf.mxu1 }
 0x8c7   :  { %2375 = vst.msk [vmem:[#allocation2 + $0x8] sm:$0xff] %vm74_vm0, %v2371_v60 }
 0x8c8   :  { %2834 = shalt.err (!%p2831_p4)
}
 0x8c9   :  { %s2848_s6 = smov 128   ;;  %s2849_s16 = smov 8  }
 0x8ca   :  { %2387 = dma.vmem_to_hbm [thread:$0]  %s2382_s14, 256, %s3515_s7, [#allocation3], %s2848_s6, %s2848_s6, %s2849_s16  }
 0x8cb   :  { %2843 = dma.done.wait [#allocation3], 256  }
 0x8cc   :  { %2844 = vsyncadd [#allocation3], 4294967040 }
 0x8cd   :  { %2391 = vsyncpa [#allocation3], 1 }

</bundles_post_ra>
